<compile_context>
chip_gen: v6e
topology: v6e:2x2x1
jax: 0.10.0
libtpu: 0.0.40
codegen_flags: <defaults>
</compile_context>

<pallas_src>
import math
import numpy as np
import jax
import jax.numpy as jnp
from jax.experimental import pallas as pl
from jax.experimental.pallas import tpu as pltpu


# -----------------------------------------------------------------------------
# host-side constants: Fold/Unfold geometry as a dense 0/1 scatter matrix
# -----------------------------------------------------------------------------
def build_fold_scatter(output_size, kernel_size, stride, padding):
    """S[k*L + l, y*W + x] = 1 iff kernel offset k of patch l lands on valid
    pixel (y, x).  Fold == (per channel) input_flat @ S; Unfold == image @ S^T."""
    H, W = output_size
    kh, kw = kernel_size
    sh, sw = stride
    ph, pw = padding
    Lh = (H + 2 * ph - kh) // sh + 1
    Lw = (W + 2 * pw - kw) // sw + 1
    L = Lh * Lw
    S = np.zeros((kh * kw * L, H * W), dtype=np.float32)
    for ki in range(kh):
        for kj in range(kw):
            k = ki * kw + kj
            for li in range(Lh):
                for lj in range(Lw):
                    l = li * Lw + lj
                    y = li * sh - ph + ki
                    xx = lj * sw - pw + kj
                    if 0 <= y < H and 0 <= xx < W:
                        S[k * L + l, y * W + xx] = 1.0
    return S, L


def _pick_row_tile(rows, max_rows=1024):
    """Row tile for the token-batched Linear kernels: full if small, otherwise
    the largest multiple-of-16 divisor (bf16 sublane tiling)."""
    if rows <= max_rows:
        return rows
    start = max_rows - (max_rows % 16)
    for rt in range(start, 0, -16):
        if rows % rt == 0:
            return rt
    return rows


# -----------------------------------------------------------------------------
# Pallas kernels
# -----------------------------------------------------------------------------
def _linear1_kernel(x_ref, w1_ref, b1_ref, feat_ref):
    """Linear1 over a tile of frame-batched tokens.
       x:(RT,D)f32  w1:(D,1960)bf16 (k-major cols)  b1:(1,1960)f32  feat:(RT,1960)bf16."""
    x = x_ref[...].astype(jnp.bfloat16)
    acc = jnp.dot(x, w1_ref[...], preferred_element_type=jnp.float32)
    feat_ref[...] = (acc + b1_ref[...]).astype(jnp.bfloat16)


def _fold_unfold_kernel(feat_ref, st_ref, sn_ref, unf_ref):
    """Per-frame Fold scatter-add + overlap-normalized Unfold + ReLU.
       feat:(QL,C)bf16  st:(HW,QL)bf16  sn:(QL,HW)bf16  unf:(QL,C)bf16.
       The folded map (HW,C) never leaves VMEM/registers."""
    fold = jnp.dot(st_ref[...], feat_ref[...],
                   preferred_element_type=jnp.float32)                  # (HW, C)
    unf = jnp.dot(sn_ref[...], fold.astype(jnp.bfloat16),
                  preferred_element_type=jnp.float32)                   # (QL, C)
    unf_ref[...] = jnp.maximum(unf, 0.0).astype(jnp.bfloat16)           # ReLU


def _linear2_kernel(act_ref, w2_ref, b2_ref, y_ref):
    """Linear2 over a tile of frame-batched tokens.
       act:(RT,1960)bf16 (k-major cols)  w2:(1960,D)bf16  b2:(1,D)f32  y:(RT,D)f32."""
    acc = jnp.dot(act_ref[...], w2_ref[...], preferred_element_type=jnp.float32)
    y_ref[...] = acc + b2_ref[...]


# -----------------------------------------------------------------------------
# module wrapper
# -----------------------------------------------------------------------------
class FusionFeedForwardPallas:
    """Pallas-TPU forward of FusionFeedForward (eval mode: Dropout = identity)."""

    def __init__(self, d_model, n_vecs, t2t_params, key, p=0.1):
        hd = 1960                                        # hardcoded in the module
        kh, kw = t2t_params["kernel_size"]
        KK = kh * kw
        assert KK == 49, "module hardcodes a 7x7 kernel (49) in its normalizer"
        assert hd % KK == 0
        C = hd // KK                                     # 40 fold channels
        H, W = t2t_params["output_size"]

        self.d_model, self.hd, self.KK, self.C = d_model, hd, KK, C
        self.output_size = (H, W)
        self.kernel_size = (kh, kw)
        self.stride = tuple(t2t_params["stride"])
        self.padding = tuple(t2t_params["padding"])
        self.HW = H * W
        self.p = p

        # ---- parameters (f32 masters, nn.Linear-style init) ----
        k1, k2, k3, k4 = jax.random.split(key, 4)
        bd1 = 1.0 / math.sqrt(d_model)
        bd2 = 1.0 / math.sqrt(hd)
        self.W1 = jax.random.uniform(k1, (d_model, hd), jnp.float32, -bd1, bd1)
        self.b1 = jax.random.uniform(k2, (hd,), jnp.float32, -bd1, bd1)
        self.W2 = jax.random.uniform(k3, (hd, d_model), jnp.float32, -bd2, bd2)
        self.b2 = jax.random.uniform(k4, (d_model,), jnp.float32, -bd2, bd2)

        # ---- Fold/Unfold geometry ----
        S, L = build_fold_scatter(self.output_size, self.kernel_size,
                                  self.stride, self.padding)
        assert L == n_vecs, "n_vecs must equal the number of patches per frame"
        self.n_vecs = L
        self.QL = L * KK
        count = np.maximum(S.sum(axis=0), np.float32(1.0)).astype(np.float32)
        inv_count = (np.float32(1.0) / count).astype(np.float32)

        # ---- regroup params/operators (absorbs all permutes host-side) ----
        # Linear1/Linear2 columns/rows regrouped k-major (new index = k*C + c),
        # so the HBM intermediates reshape for free into (B, L*KK, C).
        W1_np = np.asarray(self.W1)
        b1_np = np.asarray(self.b1)
        W2_np = np.asarray(self.W2)
        W1g = W1_np.reshape(d_model, C, KK).transpose(0, 2, 1).reshape(d_model, hd)
        b1g = b1_np.reshape(C, KK).transpose(1, 0).reshape(1, hd)
        W2g = W2_np.reshape(C, KK, d_model).transpose(1, 0, 2).reshape(hd, d_model)

        # scatter operator in (l, k)-major row order, matching the free reshape
        S_lk = S.reshape(KK, L, self.HW).transpose(1, 0, 2).reshape(self.QL, self.HW)
        St2 = np.ascontiguousarray(S_lk.T)               # (HW, QL): Fold scatter-add
        Sn2 = S_lk * inv_count[None, :]                  # (QL, HW): Unfold * 1/overlap

        # bf16 matmul operands (f32 accumulation in-kernel); biases stay f32
        self.W1g = jnp.asarray(W1g, jnp.bfloat16)
        self.b1g = jnp.asarray(b1g, jnp.float32)
        self.W2g = jnp.asarray(W2g, jnp.bfloat16)
        self.b2r = jnp.asarray(np.asarray(self.b2).reshape(1, d_model), jnp.float32)
        self.St2 = jnp.asarray(St2, jnp.bfloat16)
        self.Sn2 = jnp.asarray(Sn2, jnp.bfloat16)

    def __call__(self, x):
        b, n, D = x.shape
        assert D == self.d_model and n % self.n_vecs == 0
        L, C, KK, HW, hd, QL = self.n_vecs, self.C, self.KK, self.HW, self.hd, self.QL
        Bf = (b * n) // L                                # number of frames
        rows = Bf * L
        x_flat = x.reshape(rows, D).astype(jnp.float32)

        rt = _pick_row_tile(rows)
        par = pltpu.CompilerParams(dimension_semantics=("parallel",))

        # ---- call 1: Linear1 as one wide MXU matmul over all tokens ----------
        feat = pl.pallas_call(
            _linear1_kernel,
            out_shape=jax.ShapeDtypeStruct((rows, hd), jnp.bfloat16),
            grid=(rows // rt,),
            in_specs=[
                pl.BlockSpec((rt, D), lambda i: (i, 0)),
                pl.BlockSpec((D, hd), lambda i: (0, 0)),
                pl.BlockSpec((1, hd), lambda i: (0, 0)),
            ],
            out_specs=pl.BlockSpec((rt, hd), lambda i: (i, 0)),
            compiler_params=par,
        )(x_flat, self.W1g, self.b1g)

        # free row-major metadata reshape: columns are k-major, so
        # (Bf*L, KK*C) == (Bf, L, KK, C) == (Bf, L*KK, C) with row q = l*KK + k
        feat_lk = feat.reshape(Bf, QL, C)

        # ---- call 2: Fold + normalize + Unfold + ReLU, per frame -------------
        unf = pl.pallas_call(
            _fold_unfold_kernel,
            out_shape=jax.ShapeDtypeStruct((Bf, QL, C), jnp.bfloat16),
            grid=(Bf,),
            in_specs=[
                pl.BlockSpec((None, QL, C), lambda i: (i, 0, 0)),
                pl.BlockSpec((HW, QL), lambda i: (0, 0)),
                pl.BlockSpec((QL, HW), lambda i: (0, 0)),
            ],
            out_specs=pl.BlockSpec((None, QL, C), lambda i: (i, 0, 0)),
            compiler_params=par,
        )(feat_lk, self.St2, self.Sn2)

        # free reverse reshape back to token-major with k-major columns
        act = unf.reshape(rows, hd)

        # ---- call 3: Linear2 as one wide MXU matmul over all tokens ----------
        y = pl.pallas_call(
            _linear2_kernel,
            out_shape=jax.ShapeDtypeStruct((rows, D), jnp.float32),
            grid=(rows // rt,),
            in_specs=[
                pl.BlockSpec((rt, hd), lambda i: (i, 0)),
                pl.BlockSpec((hd, D), lambda i: (0, 0)),
                pl.BlockSpec((1, D), lambda i: (0, 0)),
            ],
            out_specs=pl.BlockSpec((rt, D), lambda i: (i, 0)),
            compiler_params=par,
        )(act, self.W2g, self.b2r)

        return y.reshape(b, n, D)


# -----------------------------------------------------------------------------
# reference (numpy, explicit fold/unfold loops, original weight layout,
# bf16 rounding mirrored at the same points as the kernels)
# -----------------------------------------------------------------------------
def _bf16(a):
    return np.asarray(jnp.asarray(np.asarray(a, np.float32))
                      .astype(jnp.bfloat16).astype(jnp.float32))


def reference_forward(x, m):
    b, n, D = x.shape
    KK, C = m.KK, m.C
    H, W = m.output_size
    kh, kw = m.kernel_size
    sh, sw = m.stride
    ph, pw = m.padding
    L = m.n_vecs
    Lw_ = (W + 2 * pw - kw) // sw + 1
    B = (b * n) // L

    xb = _bf16(x).reshape(b * n, D)
    W1b, W2b = _bf16(m.W1), _bf16(m.W2)
    b1, b2 = np.asarray(m.b1), np.asarray(m.b2)

    # conv1
    feat = xb @ W1b + b1[None, :]
    feat = _bf16(feat).reshape(B, L, C, KK)            # column j = c*49 + k

    # fold(x) and fold(ones) (the overlap count)
    folded = np.zeros((B, C, H, W), np.float32)
    count = np.zeros((H, W), np.float32)
    for l in range(L):
        li, lj = divmod(l, Lw_)
        for ki in range(kh):
            for kj in range(kw):
                y = li * sh - ph + ki
                xx = lj * sw - pw + kj
                if 0 <= y < H and 0 <= xx < W:
                    folded[:, :, y, xx] += feat[:, l, :, ki * kw + kj]
                    count[y, xx] += 1.0
    inv_cnt = _bf16(np.float32(1.0) / np.maximum(count, np.float32(1.0)))
    folded_b = _bf16(folded)

    # unfold of the normalized image
    unf = np.zeros((B, L, C, KK), np.float32)
    for l in range(L):
        li, lj = divmod(l, Lw_)
        for ki in range(kh):
            for kj in range(kw):
                y = li * sh - ph + ki
                xx = lj * sw - pw + kj
                if 0 <= y < H and 0 <= xx < W:
                    unf[:, l, :, ki * kw + kj] = folded_b[:, :, y, xx] * inv_cnt[y, xx]

    # conv2: ReLU -> (Dropout = id) -> Linear -> (Dropout = id)
    act = _bf16(np.maximum(unf, 0.0)).reshape(b * n, C * KK)
    out = act @ W2b + b2[None, :]
    return out.reshape(b, n, D)


if __name__ == "__main__":
    # small shapes consistent with the module (7x7 kernel implied by hd=1960/49)
    d_model = 128
    output_size = (16, 16)
    t2t_params = dict(kernel_size=(7, 7), stride=(3, 3), padding=(3, 3),
                      output_size=output_size)
    Lh = (output_size[0] + 2 * 3 - 7) // 3 + 1
    Lw = (output_size[1] + 2 * 3 - 7) // 3 + 1
    n_vecs = Lh * Lw                    # 36 patches per frame
    b = 2                               # batch
    t = 2                               # frames per batch element
    n = t * n_vecs                      # 72 tokens per batch element

    key = jax.random.PRNGKey(0)
    k_x, k_p = jax.random.split(key)
    x = jax.random.normal(k_x, (b, n, d_model), jnp.float32)

    model = FusionFeedForwardPallas(d_model, n_vecs, t2t_params, k_p)
    out = jax.block_until_ready(model(x))
    assert out.shape == (b, n, d_model)

    ref = reference_forward(np.asarray(x), model)
    np.testing.assert_allclose(np.asarray(out), ref, rtol=5e-3, atol=5e-3)
    print("KERNEL_OK")
</pallas_src>

<mosaic_0001>
module attributes {stable_mosaic.version = 11 : i64} {
  func.func @_linear1_kernel(%arg0: i32, %arg1: memref<144x128xf32, #tpu.memory_space<vmem>>, %arg2: memref<128x1960xbf16, #tpu.memory_space<vmem>>, %arg3: memref<1x1960xf32, #tpu.memory_space<vmem>>, %arg4: memref<144x1960xbf16, #tpu.memory_space<vmem>>) attributes {dimension_semantics = [#tpu.dimension_semantics<parallel>], iteration_bounds = array<i64: 1>, scalar_prefetch = 0 : i64, scratch_operands = 0 : i64, tpu.core_type = #tpu.core_type<tc>, window_params = [{transform_indices = @transform_0, window_bounds = array<i64: 144, 128>}, {pipeline_mode = #tpu.pipeline_mode<synchronous>, transform_indices = @transform_1, window_bounds = array<i64: 128, 1960>}, {pipeline_mode = #tpu.pipeline_mode<synchronous>, transform_indices = @transform_2, window_bounds = array<i64: 1, 1960>}, {transform_indices = @transform_3, window_bounds = array<i64: 144, 1960>}]} {
    %c0 = arith.constant 0 : index
    %c0_0 = arith.constant 0 : index
    %0 = vector.load %arg1[%c0, %c0_0] : memref<144x128xf32, #tpu.memory_space<vmem>>, vector<144x128xf32>
    %1 = arith.truncf %0 : vector<144x128xf32> to vector<144x128xbf16>
    %c0_1 = arith.constant 0 : index
    %c0_2 = arith.constant 0 : index
    %2 = vector.load %arg2[%c0_1, %c0_2] : memref<128x1960xbf16, #tpu.memory_space<vmem>>, vector<128x1960xbf16>
    %cst = arith.constant dense<0.000000e+00> : vector<144x1960xf32>
    %3 = tpu.matmul %1, %2, %cst {dimension_numbers = #tpu.dot_dimension_numbers<[1], [0], [0], [1], [0, 0, 1, 1], [], []>} : vector<144x128xbf16>, vector<128x1960xbf16>, vector<144x1960xf32> -> vector<144x1960xf32>
    %c0_3 = arith.constant 0 : index
    %c0_4 = arith.constant 0 : index
    %4 = vector.load %arg3[%c0_3, %c0_4] : memref<1x1960xf32, #tpu.memory_space<vmem>>, vector<1x1960xf32>
    %5 = vector.broadcast %4 : vector<1x1960xf32> to vector<144x1960xf32>
    %6 = arith.addf %3, %5 : vector<144x1960xf32>
    %7 = arith.truncf %6 : vector<144x1960xf32> to vector<144x1960xbf16>
    %c0_5 = arith.constant 0 : index
    %c0_6 = arith.constant 0 : index
    %8 = vector.load %arg4[%c0_5, %c0_6] : memref<144x1960xbf16, #tpu.memory_space<vmem>>, vector<144x1960xbf16>
    tpu.vector_store %arg4[%c0_5, %c0_6], %7 {strides = array<i32>} : memref<144x1960xbf16, #tpu.memory_space<vmem>>, vector<144x1960xbf16>,
    return
  }
  func.func @transform_0(%arg0: i32) -> (i32, i32) {
    %c0_i32 = arith.constant 0 : i32
    %c0_i32_0 = arith.constant 0 : i32
    return %arg0, %c0_i32 : i32, i32
  }
  func.func @transform_1(%arg0: i32) -> (i32, i32) {
    %c0_i32 = arith.constant 0 : i32
    %c0_i32_0 = arith.constant 0 : i32
    %c0_i32_1 = arith.constant 0 : i32
    return %c0_i32, %c0_i32_0 : i32, i32
  }
  func.func @transform_2(%arg0: i32) -> (i32, i32) {
    %c0_i32 = arith.constant 0 : i32
    %c0_i32_0 = arith.constant 0 : i32
    %c0_i32_1 = arith.constant 0 : i32
    return %c0_i32, %c0_i32_0 : i32, i32
  }
  func.func @transform_3(%arg0: i32) -> (i32, i32) {
    %c0_i32 = arith.constant 0 : i32
    %c0_i32_0 = arith.constant 0 : i32
    return %arg0, %c0_i32 : i32, i32
  }
}

</mosaic_0001>

<bundles_post_ra>
// kernel: tpu_custom_call.1
= control target key start
LH: loop header
LB: loop body
LE: loop exit
PB: predicated region body
PF: predicated region fallthrough
CT: control target
= control target key end

     0   :  { %v3348_v8 = vmov 0   ;;  %s4419_s0 = inlined_call_operand.vmem [shape: f32[144,128], index: 0, kind: input, shape index: {}]   ;;  %s4420_s1 = inlined_call_operand.vmem [shape: bf16[128,1960], index: 1, kind: input, shape index: {}]   ;;  %s4421_s2 = inlined_call_operand.vmem [shape: f32[1,1960], index: 2, kind: input, shape index: {}]   ;;  %s4422_s3 = inlined_call_operand.hbm [shape: bf16[144,1960], index: 3, kind: output, shape index: {}]  }
   0x1   :  { %v155_v0 = vld [vmem:[%s4420_s1 + $0x380] sm:$0xff]  ;;  %v156_v2 = vld [vmem:[%s4420_s1 + $0x388] sm:$0xff]  ;;  %927 = vmatprep.mubr.bf16.mxu0 %v3348_v8  ;;  %1050 = vmatprep.mubr.bf16.mxu1 %v3348_v8  ;;  %v157_v63 = vld [vmem:[%s4420_s1 + $0x390] sm:$0xff] }
   0x2   :  { %v163_v1 = vld [vmem:[%s4420_s1 + $0x3c0] sm:$0xff]  ;;  %v164_v4 = vld [vmem:[%s4420_s1 + $0x3c8] sm:$0xff] }
   0x3   :  { %v3019_v3 = vcombine.high %v155_v0, %v163_v1  ;;  %v3018_v5 = vcombine.low %v155_v0, %v163_v1  ;;  %v139_v6 = vld [vmem:[%s4420_s1 + $0x300] sm:$0xff]  ;;  %v3021_v9 = vcombine.high %v156_v2, %v164_v4  ;;  %v3020_v10 = vcombine.low %v156_v2, %v164_v4  ;;  %v140_v12 = vld [vmem:[%s4420_s1 + $0x308] sm:$0xff]  ;;  %v165_v0 = vld [vmem:[%s4420_s1 + $0x3d0] sm:$0xff] }
   0x4   :  { %v147_v7 = vld [vmem:[%s4420_s1 + $0x340] sm:$0xff]  ;;  %v148_v13 = vld [vmem:[%s4420_s1 + $0x348] sm:$0xff]  ;;  %v158_v1 = vld [vmem:[%s4420_s1 + $0x398] sm:$0xff] }
   0x5   :  { %v3003_v11 = vcombine.high %v139_v6, %v147_v7  ;;  %v123_v14 = vld [vmem:[%s4420_s1 + $0x280] sm:$0xff]  ;;  %895 = vmatprep.subr.bf16.mxu0 %v3019_v3  ;;  %v3005_v15 = vcombine.high %v140_v12, %v148_v13  ;;  %v124_v17 = vld [vmem:[%s4420_s1 + $0x288] sm:$0xff]  ;;  %1018 = vmatprep.subr.bf16.mxu1 %v3021_v9  ;;  %v3002_v19 = vcombine.low %v139_v6, %v147_v7  ;;  %v166_v2 = vld [vmem:[%s4420_s1 + $0x3d8] sm:$0xff] }
   0x6   :  { %v131_v16 = vld [vmem:[%s4420_s1 + $0x2c0] sm:$0xff]  ;;  %v132_v18 = vld [vmem:[%s4420_s1 + $0x2c8] sm:$0xff]  ;;  %896 = vmatpush1.bf16.msra.mxu0 %v3018_v5  ;;  %1019 = vmatpush1.bf16.msra.mxu1 %v3020_v10  ;;  %v3004_v20 = vcombine.low %v140_v12, %v148_v13  ;;  %v3023_v7 = vcombine.high %v157_v63, %v165_v0  ;;  %v3025_v9 = vcombine.high %v158_v1, %v166_v2  ;;  %v149_v12 = vld [vmem:[%s4420_s1 + $0x350] sm:$0xff] }
   0x7   :  { %897 = vmatprep.subr.bf16.mxu0 %v3003_v11  ;;  %v2987_v21 = vcombine.high %v123_v14, %v131_v16  ;;  %1020 = vmatprep.subr.bf16.mxu1 %v3005_v15  ;;  %v2989_v22 = vcombine.high %v124_v17, %v132_v18  ;;  %v107_v23 = vld [vmem:[%s4420_s1 + $0x200] sm:$0xff]  ;;  %v108_v25 = vld [vmem:[%s4420_s1 + $0x208] sm:$0xff]  ;;  %v2986_v27 = vcombine.low %v123_v14, %v131_v16  ;;  %v141_v11 = vld [vmem:[%s4420_s1 + $0x310] sm:$0xff] }
   0x8   :  { %v115_v24 = vld [vmem:[%s4420_s1 + $0x240] sm:$0xff]  ;;  %v116_v26 = vld [vmem:[%s4420_s1 + $0x248] sm:$0xff]  ;;  %v2988_v28 = vcombine.low %v124_v17, %v132_v18  ;;  %v3022_v13 = vcombine.low %v157_v63, %v165_v0  ;;  %v142_v14 = vld [vmem:[%s4420_s1 + $0x318] sm:$0xff]  ;;  %v3024_v16 = vcombine.low %v158_v1, %v166_v2  ;;  %v3007_v17 = vcombine.high %v141_v11, %v149_v12 }
   0x9   :  { %v2971_v29 = vcombine.high %v107_v23, %v115_v24  ;;  %v2973_v30 = vcombine.high %v108_v25, %v116_v26  ;;  %v91_v31 = vld [vmem:[%s4420_s1 + $0x180] sm:$0xff]  ;;  %v92_v33 = vld [vmem:[%s4420_s1 + $0x188] sm:$0xff]  ;;  %v2970_v35 = vcombine.low %v107_v23, %v115_v24  ;;  %v2972_v36 = vcombine.low %v108_v25, %v116_v26  ;;  %v150_v15 = vld [vmem:[%s4420_s1 + $0x358] sm:$0xff] }
   0xa   :  { %898 = vmatpush1.bf16.msra.mxu0 %v3002_v19  ;;  %1021 = vmatpush1.bf16.msra.mxu1 %v3004_v20  ;;  %v99_v32 = vld [vmem:[%s4420_s1 + $0x1c0] sm:$0xff]  ;;  %v100_v34 = vld [vmem:[%s4420_s1 + $0x1c8] sm:$0xff]  ;;  %v125_v18 = vld [vmem:[%s4420_s1 + $0x290] sm:$0xff]  ;;  %v3009_v20 = vcombine.high %v142_v14, %v150_v15  ;;  %v3006_v25 = vcombine.low %v141_v11, %v149_v12 }
   0xb   :  { %899 = vmatprep.subr.bf16.mxu0 %v2987_v21  ;;  %1022 = vmatprep.subr.bf16.mxu1 %v2989_v22  ;;  %v2955_v37 = vcombine.high %v91_v31, %v99_v32  ;;  %v2957_v38 = vcombine.high %v92_v33, %v100_v34  ;;  %v75_v39 = vld [vmem:[%s4420_s1 + $0x100] sm:$0xff]  ;;  %v76_v41 = vld [vmem:[%s4420_s1 + $0x108] sm:$0xff]  ;;  %v2954_v43 = vcombine.low %v91_v31, %v99_v32  ;;  %v133_v19 = vld [vmem:[%s4420_s1 + $0x2d0] sm:$0xff] }
   0xc   :  { %v83_v40 = vld [vmem:[%s4420_s1 + $0x140] sm:$0xff]  ;;  %v84_v42 = vld [vmem:[%s4420_s1 + $0x148] sm:$0xff]  ;;  %v2956_v44 = vcombine.low %v92_v33, %v100_v34  ;;  %v126_v21 = vld [vmem:[%s4420_s1 + $0x298] sm:$0xff] }
   0xd   :  { %v2939_v45 = vcombine.high %v75_v39, %v83_v40  ;;  %v2941_v46 = vcombine.high %v76_v41, %v84_v42  ;;  %v59_v47 = vld [vmem:[%s4420_s1 + $0x80] sm:$0xff]  ;;  %v60_v49 = vld [vmem:[%s4420_s1 + $0x88] sm:$0xff]  ;;  %v2938_v51 = vcombine.low %v75_v39, %v83_v40  ;;  %v2940_v52 = vcombine.low %v76_v41, %v84_v42  ;;  %v134_v22 = vld [vmem:[%s4420_s1 + $0x2d8] sm:$0xff] }
   0xe   :  { %900 = vmatpush1.bf16.msra.mxu0 %v2986_v27  ;;  %1023 = vmatpush1.bf16.msra.mxu1 %v2988_v28  ;;  %v67_v48 = vld [vmem:[%s4420_s1 + $0xc0] sm:$0xff]  ;;  %v68_v50 = vld [vmem:[%s4420_s1 + $0xc8] sm:$0xff]  ;;  %v18_v23 = vld [vmem:[%s4419_s0 + $0x10] sm:$0xff] }
   0xf   :  { %901 = vmatprep.subr.bf16.mxu0 %v2971_v29  ;;  %1024 = vmatprep.subr.bf16.mxu1 %v2973_v30  ;;  %v2923_v53 = vcombine.high %v59_v47, %v67_v48  ;;  %v2925_v54 = vcombine.high %v60_v49, %v68_v50  ;;  %v43_v55 = vld [vmem:[%s4420_s1] sm:$0xff]  ;;  %v44_v57 = vld [vmem:[%s4420_s1 + $0x8] sm:$0xff]  ;;  %v2922_v59 = vcombine.low %v59_v47, %v67_v48  ;;  %v19_v24 = vld [vmem:[%s4419_s0 + $0x18] sm:$0xff] }
  0x10   :  { %v51_v56 = vld [vmem:[%s4420_s1 + $0x40] sm:$0xff]  ;;  %v52_v58 = vld [vmem:[%s4420_s1 + $0x48] sm:$0xff]  ;;  %v2924_v60 = vcombine.low %v60_v49, %v68_v50 }
  0x11   :  { %v2907_v61 = vcombine.high %v43_v55, %v51_v56  ;;  %v2909_v62 = vcombine.high %v44_v57, %v52_v58  ;;  %v2906_v3 = vcombine.low %v43_v55, %v51_v56  ;;  %v16_v4 = vld [vmem:[%s4419_s0] sm:$0xff]  ;;  %v17_v5 = vld [vmem:[%s4419_s0 + $0x8] sm:$0xff]  ;;  %v2908_v6 = vcombine.low %v44_v57, %v52_v58 }
  0x12   :  { %902 = vmatpush1.bf16.msra.mxu0 %v2970_v35  ;;  %1025 = vmatpush1.bf16.msra.mxu1 %v2972_v36  ;;  %v3488_v10 = vpack.c.bf16 %v17_v5, %v16_v4 }
  0x13   :  { %903 = vmatprep.subr.bf16.mxu0 %v2955_v37  ;;  %1026 = vmatprep.subr.bf16.mxu1 %v2957_v38 }
  0x16   :  { %904 = vmatpush1.bf16.msra.mxu0 %v2954_v43  ;;  %1027 = vmatpush1.bf16.msra.mxu1 %v2956_v44 }
  0x17   :  { %905 = vmatprep.subr.bf16.mxu0 %v2939_v45  ;;  %1028 = vmatprep.subr.bf16.mxu1 %v2941_v46 }
  0x1a   :  { %906 = vmatpush1.bf16.msra.mxu0 %v2938_v51  ;;  %1029 = vmatpush1.bf16.msra.mxu1 %v2940_v52 }
  0x1b   :  { %907 = vmatprep.subr.bf16.mxu0 %v2923_v53  ;;  %1030 = vmatprep.subr.bf16.mxu1 %v2925_v54 }
  0x1e   :  { %908 = vmatpush1.bf16.msra.mxu0 %v2922_v59  ;;  %1031 = vmatpush1.bf16.msra.mxu1 %v2924_v60 }
  0x1f   :  { %909 = vmatprep.subr.bf16.mxu0 %v2907_v61  ;;  %1032 = vmatprep.subr.bf16.mxu1 %v2909_v62 }
  0x22   :  { %910 = vmatpush1.bf16.msra.mxu0 %v2906_v3  ;;  %1033 = vmatpush1.bf16.msra.mxu1 %v2908_v6 }
  0x23   :  { %1141 = vmatprep.subr.bf16.mxu0 %v3023_v7  ;;  %1264 = vmatprep.subr.bf16.mxu1 %v3025_v9 }
  0x25   :  { %928 = vmatmul.mubr.bf16.vlgmr.msra.gmra.mxu0 %v3488_v10  ;;  %1051 = vmatmul.mubr.bf16.vlgmr.msra.gmra.mxu1 %v3488_v10 }
  0x26   :  { %1142 = vmatpush1.bf16.msra.mxu0 %v3022_v13 }
  0x27   :  { %8 = vsyncpa [#allocation3], 0  ;;  %1265 = vmatpush1.bf16.msra.mxu1 %v3024_v16  ;;  %937 = vmatprep.mubr.bf16.mxu0 %v3348_v8  ;;  %v3008_v26 = vcombine.low %v142_v14, %v150_v15  ;;  %v2991_v27 = vcombine.high %v125_v18, %v133_v19  ;;  %v2993_v28 = vcombine.high %v126_v21, %v134_v22  ;;  %v109_v30 = vld [vmem:[%s4420_s1 + $0x210] sm:$0xff]  ;;  %v110_v32 = vld [vmem:[%s4420_s1 + $0x218] sm:$0xff]  ;;  %vm2750_vm0 = vcmask 1043456  }
  0x28   :  { %1060 = vmatprep.mubr.bf16.mxu1 %v3348_v8  ;;  %1143 = vmatprep.subr.bf16.mxu0 %v3007_v17  ;;  %v3524_v29 = vpack.c.bf16 %v19_v24, %v18_v23  ;;  %v117_v31 = vld [vmem:[%s4420_s1 + $0x250] sm:$0xff]  ;;  %v118_v33 = vld [vmem:[%s4420_s1 + $0x258] sm:$0xff]  ;;  %v2990_v34 = vcombine.low %v125_v18, %v133_v19  ;;  %v2992_v35 = vcombine.low %v126_v21, %v134_v22  ;;  %v20_v37 = vld [vmem:[%s4419_s0 + $0x20] sm:$0xff]  ;;  %vm2751_vm1 = vcmask 326660  }
  0x29   :  { %1266 = vmatprep.subr.bf16.mxu1 %v3009_v20  ;;  %v2975_v36 = vcombine.high %v109_v30, %v117_v31  ;;  %v2977_v38 = vcombine.high %v110_v32, %v118_v33  ;;  %v93_v39 = vld [vmem:[%s4420_s1 + $0x190] sm:$0xff]  ;;  %v21_v41 = vld [vmem:[%s4419_s0 + $0x28] sm:$0xff]  ;;  %v94_v42 = vld [vmem:[%s4420_s1 + $0x198] sm:$0xff]  ;;  %v2974_v44 = vcombine.low %v109_v30, %v117_v31  ;;  %v2976_v45 = vcombine.low %v110_v32, %v118_v33 }
  0x2a   :  { %1144 = vmatpush1.bf16.msra.mxu0 %v3006_v25  ;;  %v101_v40 = vld [vmem:[%s4420_s1 + $0x1d0] sm:$0xff]  ;;  %v102_v43 = vld [vmem:[%s4420_s1 + $0x1d8] sm:$0xff]  ;;  %v3560_v47 = vpack.c.bf16 %v21_v41, %v20_v37  ;;  %v24_v13 = vld [vmem:[%s4419_s0 + $0x40] sm:$0xff] }
  0x2b   :  { %1267 = vmatpush1.bf16.msra.mxu1 %v3008_v26  ;;  %1145 = vmatprep.subr.bf16.mxu0 %v2991_v27  ;;  %v2959_v46 = vcombine.high %v93_v39, %v101_v40  ;;  %v2961_v48 = vcombine.high %v94_v42, %v102_v43  ;;  %v77_v49 = vld [vmem:[%s4420_s1 + $0x110] sm:$0xff]  ;;  %v78_v51 = vld [vmem:[%s4420_s1 + $0x118] sm:$0xff]  ;;  %v2958_v53 = vcombine.low %v93_v39, %v101_v40  ;;  %v3617_v15 = vld [vmem:[%s4420_s1 + $0x3a0] sm:$0xff] }
  0x2c   :  { %1268 = vmatprep.subr.bf16.mxu1 %v2993_v28  ;;  %v85_v50 = vld [vmem:[%s4420_s1 + $0x150] sm:$0xff]  ;;  %v86_v52 = vld [vmem:[%s4420_s1 + $0x158] sm:$0xff]  ;;  %v2960_v54 = vcombine.low %v94_v42, %v102_v43  ;;  %v3622_v16 = vld [vmem:[%s4420_s1 + $0x3e0] sm:$0xff] }
  0x2d   :  { %938 = vmatmul.mubr.bf16.gmra.mxu0 %v3524_v29  ;;  %1061 = vmatmul.mubr.bf16.gmra.mxu1 %v3524_v29  ;;  %v2943_v55 = vcombine.high %v77_v49, %v85_v50  ;;  %v22_v56 = vld [vmem:[%s4419_s0 + $0x30] sm:$0xff]  ;;  %v2945_v57 = vcombine.high %v78_v51, %v86_v52  ;;  %v23_v60 = vld [vmem:[%s4419_s0 + $0x38] sm:$0xff]  ;;  %v2942_v63 = vcombine.low %v77_v49, %v85_v50  ;;  %v25_v17 = vld [vmem:[%s4419_s0 + $0x48] sm:$0xff] }
  0x2e   :  { %947 = vmatprep.mubr.bf16.mxu0 %v3348_v8  ;;  %1070 = vmatprep.mubr.bf16.mxu1 %v3348_v8  ;;  %v61_v58 = vld [vmem:[%s4420_s1 + $0x90] sm:$0xff]  ;;  %v62_v61 = vld [vmem:[%s4420_s1 + $0x98] sm:$0xff]  ;;  %v2944_v0 = vcombine.low %v78_v51, %v86_v52  ;;  %v3596_v2 = vpack.c.bf16 %v23_v60, %v22_v56  ;;  %v3632_v18 = vld [vmem:[%s4420_s1 + $0x3a8] sm:$0xff]  ;;  %v3027_v22 = vcombine.high %v3617_v15, %v3622_v16 }
  0x2f   :  { %1146 = vmatpush1.bf16.msra.mxu0 %v2990_v34  ;;  %1269 = vmatpush1.bf16.msra.mxu1 %v2992_v35  ;;  %v69_v59 = vld [vmem:[%s4420_s1 + $0xd0] sm:$0xff]  ;;  %v70_v62 = vld [vmem:[%s4420_s1 + $0xd8] sm:$0xff]  ;;  %v3637_v19 = vld [vmem:[%s4420_s1 + $0x3e8] sm:$0xff]  ;;  %v3642_v23 = vpack.c.bf16 %v25_v17, %v24_v13  ;;  %v3026_v40 = vcombine.low %v3617_v15, %v3622_v16 }
  0x30   :  { %1147 = vmatprep.subr.bf16.mxu0 %v2975_v36  ;;  %1270 = vmatprep.subr.bf16.mxu1 %v2977_v38  ;;  %v2927_v1 = vcombine.high %v61_v58, %v69_v59  ;;  %v2929_v3 = vcombine.high %v62_v61, %v70_v62  ;;  %v45_v4 = vld [vmem:[%s4420_s1 + $0x10] sm:$0xff]  ;;  %v46_v6 = vld [vmem:[%s4420_s1 + $0x18] sm:$0xff]  ;;  %v2926_v9 = vcombine.low %v61_v58, %v69_v59  ;;  %v28_v28 = vld [vmem:[%s4419_s0 + $0x60] sm:$0xff] }
  0x31   :  { %v53_v5 = vld [vmem:[%s4420_s1 + $0x50] sm:$0xff]  ;;  %v54_v7 = vld [vmem:[%s4420_s1 + $0x58] sm:$0xff]  ;;  %v2928_v11 = vcombine.low %v62_v61, %v70_v62  ;;  %v3029_v24 = vcombine.high %v3632_v18, %v3637_v19  ;;  %v29_v30 = vld [vmem:[%s4419_s0 + $0x68] sm:$0xff]  ;;  %v3028_v43 = vcombine.low %v3632_v18, %v3637_v19 }
  0x32   :  { %v2911_v12 = vcombine.high %v45_v4, %v53_v5  ;;  %v2913_v14 = vcombine.high %v46_v6, %v54_v7  ;;  %v2910_v20 = vcombine.low %v45_v4, %v53_v5  ;;  %v2912_v21 = vcombine.low %v46_v6, %v54_v7  ;;  %v26_v25 = vld [vmem:[%s4419_s0 + $0x50] sm:$0xff]  ;;  %v27_v26 = vld [vmem:[%s4419_s0 + $0x58] sm:$0xff]  ;;  %v32_v35 = vld [vmem:[%s4419_s0 + $0x80] sm:$0xff] }
  0x33   :  { %1148 = vmatpush1.bf16.msra.mxu0 %v2974_v44  ;;  %1271 = vmatpush1.bf16.msra.mxu1 %v2976_v45  ;;  %v3656_v27 = vpack.c.bf16 %v27_v26, %v26_v25  ;;  %v3668_v31 = vpack.c.bf16 %v29_v30, %v28_v28  ;;  %v30_v32 = vld [vmem:[%s4419_s0 + $0x70] sm:$0xff]  ;;  %v31_v33 = vld [vmem:[%s4419_s0 + $0x78] sm:$0xff]  ;;  %v33_v36 = vld [vmem:[%s4419_s0 + $0x88] sm:$0xff] }
  0x34   :  { %1149 = vmatprep.subr.bf16.mxu0 %v2959_v46  ;;  %1272 = vmatprep.subr.bf16.mxu1 %v2961_v48  ;;  %v3680_v34 = vpack.c.bf16 %v31_v33, %v30_v32  ;;  %v3692_v37 = vpack.c.bf16 %v33_v36, %v32_v35  ;;  %v143_v38 = vld [vmem:[%s4420_s1 + $0x320] sm:$0xff]  ;;  %v144_v41 = vld [vmem:[%s4420_s1 + $0x328] sm:$0xff]  ;;  %vm4308_vm2 = vmor %vm2751_vm1, %vm2750_vm0 }
  0x35   :  { %948 = vmatmul.mubr.bf16.gmra.mxu0 %v3560_v47  ;;  %1071 = vmatmul.mubr.bf16.gmra.mxu1 %v3560_v47  ;;  %v151_v39 = vld [vmem:[%s4420_s1 + $0x360] sm:$0xff]  ;;  %v152_v42 = vld [vmem:[%s4420_s1 + $0x368] sm:$0xff] }
  0x36   :  { %957 = vmatprep.mubr.bf16.mxu0 %v3348_v8  ;;  %1080 = vmatprep.mubr.bf16.mxu1 %v3348_v8  ;;  %v3011_v44 = vcombine.high %v143_v38, %v151_v39  ;;  %v127_v45 = vld [vmem:[%s4420_s1 + $0x2a0] sm:$0xff]  ;;  %v3013_v48 = vcombine.high %v144_v41, %v152_v42  ;;  %v128_v49 = vld [vmem:[%s4420_s1 + $0x2a8] sm:$0xff]  ;;  %v3010_v51 = vcombine.low %v143_v38, %v151_v39 }
  0x37   :  { %1150 = vmatpush1.bf16.msra.mxu0 %v2958_v53  ;;  %1273 = vmatpush1.bf16.msra.mxu1 %v2960_v54  ;;  %v135_v46 = vld [vmem:[%s4420_s1 + $0x2e0] sm:$0xff]  ;;  %v136_v50 = vld [vmem:[%s4420_s1 + $0x2e8] sm:$0xff]  ;;  %v3012_v52 = vcombine.low %v144_v41, %v152_v42  ;;  %v169_v41 = vld [vmem:[%s4420_s1 + $0x3f0] sm:$0xff] }
  0x38   :  { %1151 = vmatprep.subr.bf16.mxu0 %v2943_v55  ;;  %1274 = vmatprep.subr.bf16.mxu1 %v2945_v57  ;;  %v2995_v53 = vcombine.high %v127_v45, %v135_v46  ;;  %v2997_v54 = vcombine.high %v128_v49, %v136_v50  ;;  %v111_v55 = vld [vmem:[%s4420_s1 + $0x220] sm:$0xff]  ;;  %v112_v57 = vld [vmem:[%s4420_s1 + $0x228] sm:$0xff]  ;;  %v2994_v59 = vcombine.low %v127_v45, %v135_v46  ;;  %v162_v42 = vld [vmem:[%s4420_s1 + $0x3b8] sm:$0xff] }
  0x39   :  { %v119_v56 = vld [vmem:[%s4420_s1 + $0x260] sm:$0xff]  ;;  %v120_v58 = vld [vmem:[%s4420_s1 + $0x268] sm:$0xff]  ;;  %v2996_v60 = vcombine.low %v128_v49, %v136_v50  ;;  %v145_v49 = vld [vmem:[%s4420_s1 + $0x330] sm:$0xff] }
  0x3a   :  { %v2979_v61 = vcombine.high %v111_v55, %v119_v56  ;;  %v2981_v62 = vcombine.high %v112_v57, %v120_v58  ;;  %v2978_v4 = vcombine.low %v111_v55, %v119_v56  ;;  %v2980_v5 = vcombine.low %v112_v57, %v120_v58  ;;  %v88_v13 = vld [vmem:[%s4420_s1 + $0x168] sm:$0xff]  ;;  %v63_v18 = vld [vmem:[%s4420_s1 + $0xa0] sm:$0xff]  ;;  %v153_v50 = vld [vmem:[%s4420_s1 + $0x370] sm:$0xff] }
  0x3b   :  { %1152 = vmatpush1.bf16.msra.mxu0 %v2942_v63  ;;  %1275 = vmatpush1.bf16.msra.mxu1 %v2944_v0  ;;  %v95_v63 = vld [vmem:[%s4420_s1 + $0x1a0] sm:$0xff]  ;;  %v48_v32 = vld [vmem:[%s4420_s1 + $0x28] sm:$0xff]  ;;  %v3015_v55 = vcombine.high %v145_v49, %v153_v50  ;;  %v129_v56 = vld [vmem:[%s4420_s1 + $0x2b0] sm:$0xff] }
  0x3c   :  { %1153 = vmatprep.subr.bf16.mxu0 %v2927_v1  ;;  %1276 = vmatprep.subr.bf16.mxu1 %v2929_v3  ;;  %v103_v0 = vld [vmem:[%s4420_s1 + $0x1e0] sm:$0xff]  ;;  %v96_v1 = vld [vmem:[%s4420_s1 + $0x1a8] sm:$0xff]  ;;  %v137_v57 = vld [vmem:[%s4420_s1 + $0x2f0] sm:$0xff] }
  0x3d   :  { %958 = vmatmul.mubr.bf16.gmra.mxu0 %v3596_v2  ;;  %1081 = vmatmul.mubr.bf16.gmra.mxu1 %v3596_v2  ;;  %v104_v3 = vld [vmem:[%s4420_s1 + $0x1e8] sm:$0xff]  ;;  %v2963_v6 = vcombine.high %v95_v63, %v103_v0  ;;  %v71_v19 = vld [vmem:[%s4420_s1 + $0xe0] sm:$0xff] }
  0x3e   :  { %967 = vmatprep.mubr.bf16.mxu0 %v3348_v8  ;;  %1090 = vmatprep.mubr.bf16.mxu1 %v3348_v8  ;;  %v2965_v7 = vcombine.high %v96_v1, %v104_v3  ;;  %v2964_v15 = vcombine.low %v96_v1, %v104_v3  ;;  %v2931_v25 = vcombine.high %v63_v18, %v71_v19  ;;  %v47_v28 = vld [vmem:[%s4420_s1 + $0x20] sm:$0xff]  ;;  %v56_v33 = vld [vmem:[%s4420_s1 + $0x68] sm:$0xff]  ;;  %v113_v1 = vld [vmem:[%s4420_s1 + $0x230] sm:$0xff] }
  0x3f   :  { %1154 = vmatpush1.bf16.msra.mxu0 %v2926_v9  ;;  %1277 = vmatpush1.bf16.msra.mxu1 %v2928_v11  ;;  %v79_v9 = vld [vmem:[%s4420_s1 + $0x120] sm:$0xff]  ;;  %v2930_v35 = vcombine.low %v63_v18, %v71_v19  ;;  %v2917_v39 = vcombine.high %v48_v32, %v56_v33  ;;  %v2916_v45 = vcombine.low %v48_v32, %v56_v33  ;;  %v121_v3 = vld [vmem:[%s4420_s1 + $0x270] sm:$0xff] }
  0x40   :  { %1155 = vmatprep.subr.bf16.mxu0 %v2911_v12  ;;  %1278 = vmatprep.subr.bf16.mxu1 %v2913_v14  ;;  %v87_v11 = vld [vmem:[%s4420_s1 + $0x160] sm:$0xff]  ;;  %v80_v12 = vld [vmem:[%s4420_s1 + $0x128] sm:$0xff]  ;;  %v2962_v14 = vcombine.low %v95_v63, %v103_v0  ;;  %v2999_v63 = vcombine.high %v129_v56, %v137_v57  ;;  %v65_v32 = vld [vmem:[%s4420_s1 + $0xb0] sm:$0xff] }
  0x41   :  { %v2947_v16 = vcombine.high %v79_v9, %v87_v11  ;;  %v2949_v17 = vcombine.high %v80_v12, %v88_v13  ;;  %v55_v30 = vld [vmem:[%s4420_s1 + $0x60] sm:$0xff]  ;;  %v73_v33 = vld [vmem:[%s4420_s1 + $0xf0] sm:$0xff] }
  0x42   :  { %v2915_v38 = vcombine.high %v47_v28, %v55_v30 }
  0x43   :  { %1156 = vmatpush1.bf16.msra.mxu0 %v2910_v20  ;;  %1279 = vmatpush1.bf16.msra.mxu1 %v2912_v21  ;;  %v64_v20 = vld [vmem:[%s4420_s1 + $0xa8] sm:$0xff] }
  0x44   :  { %1387 = vmatprep.subr.bf16.mxu0 %v3027_v22  ;;  %1510 = vmatprep.subr.bf16.mxu1 %v3029_v24  ;;  %v72_v21 = vld [vmem:[%s4420_s1 + $0xe8] sm:$0xff]  ;;  %v2946_v22 = vcombine.low %v79_v9, %v87_v11  ;;  %v2948_v24 = vcombine.low %v80_v12, %v88_v13  ;;  %v2983_v9 = vcombine.high %v113_v1, %v121_v3  ;;  %v97_v12 = vld [vmem:[%s4420_s1 + $0x1b0] sm:$0xff] }
  0x45   :  { %968 = vmatmul.mubr.bf16.gmra.mxu0 %v3642_v23  ;;  %1091 = vmatmul.mubr.bf16.gmra.mxu1 %v3642_v23  ;;  %v2933_v26 = vcombine.high %v64_v20, %v72_v21  ;;  %v2932_v36 = vcombine.low %v64_v20, %v72_v21  ;;  %v105_v13 = vld [vmem:[%s4420_s1 + $0x1f0] sm:$0xff] }
  0x46   :  { %977 = vmatprep.mubr.bf16.mxu0 %v3348_v8  ;;  %1100 = vmatprep.mubr.bf16.mxu1 %v3348_v8  ;;  %v2967_v18 = vcombine.high %v97_v12, %v105_v13  ;;  %v81_v20 = vld [vmem:[%s4420_s1 + $0x130] sm:$0xff] }
  0x47   :  { %v89_v21 = vld [vmem:[%s4420_s1 + $0x170] sm:$0xff] }
  0x4d   :  { %978 = vmatmul.mubr.bf16.gmra.mxu0 %v3656_v27  ;;  %1101 = vmatmul.mubr.bf16.gmra.mxu1 %v3656_v27 }
  0x4e   :  { %987 = vmatprep.mubr.bf16.mxu0 %v3348_v8  ;;  %1110 = vmatprep.mubr.bf16.mxu1 %v3348_v8 }
  0x55   :  { %988 = vmatmul.mubr.bf16.gmra.mxu0 %v3668_v31  ;;  %1111 = vmatmul.mubr.bf16.gmra.mxu1 %v3668_v31 }
  0x56   :  { %997 = vmatprep.mubr.bf16.mxu0 %v3348_v8  ;;  %1120 = vmatprep.mubr.bf16.mxu1 %v3348_v8 }
  0x5d   :  { %998 = vmatmul.mubr.bf16.gmra.mxu0 %v3680_v34  ;;  %1121 = vmatmul.mubr.bf16.gmra.mxu1 %v3680_v34 }
  0x5e   :  { %1007 = vmatprep.mubr.bf16.mxu0 %v3348_v8  ;;  %1130 = vmatprep.mubr.bf16.mxu1 %v3348_v8 }
  0x65   :  { %1008 = vmatmul.mubr.bf16.gmra.mxu0 %v3692_v37  ;;  %1131 = vmatmul.mubr.bf16.gmra.mxu1 %v3692_v37 }
  0x66   :  { %1173 = vmatprep.mubr.bf16.mxu0 %v3348_v8  ;;  %1296 = vmatprep.mubr.bf16.mxu1 %v3348_v8 }
  0x6d   :  { %1174 = vmatmul.mubr.bf16.vlgmr.msra.gmra.mxu0 %v3488_v10  ;;  %1297 = vmatmul.mubr.bf16.vlgmr.msra.gmra.mxu1 %v3488_v10 }
  0x6e   :  { %1388 = vmatpush1.bf16.msra.mxu0 %v3026_v40  ;;  %1511 = vmatpush1.bf16.msra.mxu1 %v3028_v43  ;;  %v161_v40 = vld [vmem:[%s4420_s1 + $0x3b0] sm:$0xff]  ;;  %v170_v43 = vld [vmem:[%s4420_s1 + $0x3f8] sm:$0xff] }
  0x6f   :  { %1183 = vmatprep.mubr.bf16.mxu0 %v3348_v8  ;;  %1306 = vmatprep.mubr.bf16.mxu1 %v3348_v8  ;;  %v3031_v46 = vcombine.high %v161_v40, %v169_v41 }
  0x70   :  { %1389 = vmatprep.subr.bf16.mxu0 %v3011_v44  ;;  %1512 = vmatprep.subr.bf16.mxu1 %v3013_v48  ;;  %v2914_v44 = vcombine.low %v47_v28, %v55_v30  ;;  %v3033_v48 = vcombine.high %v162_v42, %v170_v43  ;;  %v2951_v28 = vcombine.high %v81_v20, %v89_v21 }
  0x72   :  { %1390 = vmatpush1.bf16.msra.mxu0 %v3010_v51  ;;  %1513 = vmatpush1.bf16.msra.mxu1 %v3012_v52  ;;  %v3030_v51 = vcombine.low %v161_v40, %v169_v41  ;;  %v146_v52 = vld [vmem:[%s4420_s1 + $0x338] sm:$0xff]  ;;  %v2935_v40 = vcombine.high %v65_v32, %v73_v33 }
  0x73   :  { %1391 = vmatprep.subr.bf16.mxu0 %v2995_v53  ;;  %1514 = vmatprep.subr.bf16.mxu1 %v2997_v54  ;;  %v154_v53 = vld [vmem:[%s4420_s1 + $0x378] sm:$0xff]  ;;  %v3032_v54 = vcombine.low %v162_v42, %v170_v43  ;;  %v49_v42 = vld [vmem:[%s4420_s1 + $0x30] sm:$0xff] }
  0x74   :  { %v3017_v58 = vcombine.high %v146_v52, %v154_v53  ;;  %v57_v43 = vld [vmem:[%s4420_s1 + $0x70] sm:$0xff] }
  0x75   :  { %1184 = vmatmul.mubr.bf16.gmra.mxu0 %v3524_v29  ;;  %1307 = vmatmul.mubr.bf16.gmra.mxu1 %v3524_v29 }
  0x76   :  { %1193 = vmatprep.mubr.bf16.mxu0 %v3348_v8  ;;  %1316 = vmatprep.mubr.bf16.mxu1 %v3348_v8 }
  0x77   :  { %1392 = vmatpush1.bf16.msra.mxu0 %v2994_v59  ;;  %1515 = vmatpush1.bf16.msra.mxu1 %v2996_v60  ;;  %v130_v59 = vld [vmem:[%s4420_s1 + $0x2b8] sm:$0xff] }
  0x78   :  { %1393 = vmatprep.subr.bf16.mxu0 %v2979_v61  ;;  %1516 = vmatprep.subr.bf16.mxu1 %v2981_v62  ;;  %v138_v60 = vld [vmem:[%s4420_s1 + $0x2f8] sm:$0xff]  ;;  %v3014_v61 = vcombine.low %v145_v49, %v153_v50  ;;  %v3016_v62 = vcombine.low %v146_v52, %v154_v53  ;;  %v2919_v49 = vcombine.high %v49_v42, %v57_v43  ;;  %v175_v53 = vlaneseq }
  0x79   :  { %v3001_v0 = vcombine.high %v130_v59, %v138_v60 }
  0x7b   :  { %1394 = vmatpush1.bf16.msra.mxu0 %v2978_v4  ;;  %1517 = vmatpush1.bf16.msra.mxu1 %v2980_v5  ;;  %v114_v4 = vld [vmem:[%s4420_s1 + $0x238] sm:$0xff] }
  0x7c   :  { %1395 = vmatprep.subr.bf16.mxu0 %v2963_v6  ;;  %1518 = vmatprep.subr.bf16.mxu1 %v2965_v7  ;;  %v122_v5 = vld [vmem:[%s4420_s1 + $0x278] sm:$0xff]  ;;  %v2998_v6 = vcombine.low %v129_v56, %v137_v57  ;;  %v3000_v7 = vcombine.low %v130_v59, %v138_v60  ;;  %v3949_v57 = vld [vmem:[%s4421_s2] sm:$0xff] }
  0x7d   :  { %1194 = vmatmul.mubr.bf16.gmra.mxu0 %v3560_v47  ;;  %1317 = vmatmul.mubr.bf16.gmra.mxu1 %v3560_v47  ;;  %v2985_v11 = vcombine.high %v114_v4, %v122_v5 }
  0x7e   :  { %1203 = vmatprep.mubr.bf16.mxu0 %v3348_v8  ;;  %1326 = vmatprep.mubr.bf16.mxu1 %v3348_v8 }
  0x7f   :  { %1396 = vmatpush1.bf16.msra.mxu0 %v2962_v14  ;;  %1519 = vmatpush1.bf16.msra.mxu1 %v2964_v15  ;;  %v98_v14 = vld [vmem:[%s4420_s1 + $0x1b8] sm:$0xff] }
  0x80   :  { %1397 = vmatprep.subr.bf16.mxu0 %v2947_v16  ;;  %1520 = vmatprep.subr.bf16.mxu1 %v2949_v17  ;;  %v106_v15 = vld [vmem:[%s4420_s1 + $0x1f8] sm:$0xff]  ;;  %v2982_v16 = vcombine.low %v113_v1, %v121_v3  ;;  %v2984_v17 = vcombine.low %v114_v4, %v122_v5 }
  0x81   :  { %v2969_v19 = vcombine.high %v98_v14, %v106_v15 }
  0x83   :  { %1398 = vmatpush1.bf16.msra.mxu0 %v2946_v22  ;;  %1521 = vmatpush1.bf16.msra.mxu1 %v2948_v24  ;;  %v82_v22 = vld [vmem:[%s4420_s1 + $0x138] sm:$0xff] }
  0x84   :  { %1399 = vmatprep.subr.bf16.mxu0 %v2931_v25  ;;  %1522 = vmatprep.subr.bf16.mxu1 %v2933_v26  ;;  %v90_v24 = vld [vmem:[%s4420_s1 + $0x178] sm:$0xff]  ;;  %v2966_v25 = vcombine.low %v97_v12, %v105_v13  ;;  %v2968_v26 = vcombine.low %v98_v14, %v106_v15 }
  0x85   :  { %1204 = vmatmul.mubr.bf16.gmra.mxu0 %v3596_v2  ;;  %1327 = vmatmul.mubr.bf16.gmra.mxu1 %v3596_v2  ;;  %v2953_v30 = vcombine.high %v82_v22, %v90_v24 }
  0x86   :  { %1213 = vmatprep.mubr.bf16.mxu0 %v3348_v8  ;;  %1336 = vmatprep.mubr.bf16.mxu1 %v3348_v8 }
  0x87   :  { %1400 = vmatpush1.bf16.msra.mxu0 %v2930_v35  ;;  %1523 = vmatpush1.bf16.msra.mxu1 %v2932_v36  ;;  %v66_v35 = vld [vmem:[%s4420_s1 + $0xb8] sm:$0xff] }
  0x88   :  { %1401 = vmatprep.subr.bf16.mxu0 %v2915_v38  ;;  %1524 = vmatprep.subr.bf16.mxu1 %v2917_v39  ;;  %v74_v36 = vld [vmem:[%s4420_s1 + $0xf8] sm:$0xff]  ;;  %v2950_v38 = vcombine.low %v81_v20, %v89_v21  ;;  %v2952_v39 = vcombine.low %v82_v22, %v90_v24 }
  0x89   :  { %v2937_v41 = vcombine.high %v66_v35, %v74_v36 }
  0x8b   :  { %1402 = vmatpush1.bf16.msra.mxu0 %v2914_v44  ;;  %1525 = vmatpush1.bf16.msra.mxu1 %v2916_v45  ;;  %v50_v44 = vld [vmem:[%s4420_s1 + $0x38] sm:$0xff] }
  0x8c   :  { %1633 = vmatprep.subr.bf16.mxu0 %v3031_v46  ;;  %1756 = vmatprep.subr.bf16.mxu1 %v3033_v48  ;;  %v58_v45 = vld [vmem:[%s4420_s1 + $0x78] sm:$0xff]  ;;  %v2934_v46 = vcombine.low %v65_v32, %v73_v33  ;;  %v2936_v48 = vcombine.low %v66_v35, %v74_v36 }
  0x8d   :  { %1214 = vmatmul.mubr.bf16.gmra.mxu0 %v3642_v23  ;;  %1337 = vmatmul.mubr.bf16.gmra.mxu1 %v3642_v23  ;;  %v2921_v50 = vcombine.high %v50_v44, %v58_v45  ;;  %v2920_v52 = vcombine.low %v50_v44, %v58_v45 }
  0x8e   :  { %1223 = vmatprep.mubr.bf16.mxu0 %v3348_v8  ;;  %1346 = vmatprep.mubr.bf16.mxu1 %v3348_v8 }
  0x95   :  { %1224 = vmatmul.mubr.bf16.gmra.mxu0 %v3656_v27  ;;  %1347 = vmatmul.mubr.bf16.gmra.mxu1 %v3656_v27 }
  0x96   :  { %1233 = vmatprep.mubr.bf16.mxu0 %v3348_v8  ;;  %1356 = vmatprep.mubr.bf16.mxu1 %v3348_v8 }
  0x9d   :  { %1234 = vmatmul.mubr.bf16.gmra.mxu0 %v3668_v31  ;;  %1357 = vmatmul.mubr.bf16.gmra.mxu1 %v3668_v31 }
  0x9e   :  { %1243 = vmatprep.mubr.bf16.mxu0 %v3348_v8  ;;  %1366 = vmatprep.mubr.bf16.mxu1 %v3348_v8 }
  0xa5   :  { %1244 = vmatmul.mubr.bf16.gmra.mxu0 %v3680_v34  ;;  %1367 = vmatmul.mubr.bf16.gmra.mxu1 %v3680_v34 }
  0xa6   :  { %1253 = vmatprep.mubr.bf16.mxu0 %v3348_v8  ;;  %1376 = vmatprep.mubr.bf16.mxu1 %v3348_v8 }
  0xad   :  { %1254 = vmatmul.mubr.bf16.gmra.mxu0 %v3692_v37  ;;  %1377 = vmatmul.mubr.bf16.gmra.mxu1 %v3692_v37 }
  0xae   :  { %1419 = vmatprep.mubr.bf16.mxu0 %v3348_v8  ;;  %1542 = vmatprep.mubr.bf16.mxu1 %v3348_v8 }
  0xb5   :  { %1420 = vmatmul.mubr.bf16.vlgmr.msra.gmra.mxu0 %v3488_v10  ;;  %1543 = vmatmul.mubr.bf16.vlgmr.msra.gmra.mxu1 %v3488_v10 }
  0xb6   :  { %1634 = vmatpush1.bf16.msra.mxu0 %v3030_v51  ;;  %1757 = vmatpush1.bf16.msra.mxu1 %v3032_v54  ;;  %v2918_v51 = vcombine.low %v49_v42, %v57_v43  ;;  %v3938_v54 = vshrl.u32 %v175_v53, 7 }
  0xb7   :  { %1429 = vmatprep.mubr.bf16.mxu0 %v3348_v8  ;;  %1552 = vmatprep.mubr.bf16.mxu1 %v3348_v8 }
  0xb8   :  { %1635 = vmatprep.subr.bf16.mxu0 %v3015_v55  ;;  %1758 = vmatprep.subr.bf16.mxu1 %v3017_v58  ;;  %v177_v55 = vsub.s32 0, %v3938_v54  ;;  %v181_v56 = vsub.s32 1, %v3938_v54  ;;  %v185_v58 = vsub.s32 2, %v3938_v54  ;;  %v189_v59 = vsub.s32 3, %v3938_v54 }
  0xba   :  { %1636 = vmatpush1.bf16.msra.mxu0 %v3014_v61  ;;  %1759 = vmatpush1.bf16.msra.mxu1 %v3016_v62  ;;  %v3956_v60 = vrot.slane %v3949_v57, %v177_v55  ;;  %v3961_v61 = vrot.slane %v3949_v57, %v181_v56 }
  0xbb   :  { %1637 = vmatprep.subr.bf16.mxu0 %v2999_v63  ;;  %1760 = vmatprep.subr.bf16.mxu1 %v3001_v0  ;;  %v3966_v63 = vrot.slane %v3949_v57, %v185_v58  ;;  %v3972_v0 = vrot.slane %v3949_v57, %v189_v59 }
  0xbd   :  { %1430 = vmatmul.mubr.bf16.gmra.mxu0 %v3524_v29  ;;  %1553 = vmatmul.mubr.bf16.gmra.mxu1 %v3524_v29 }
  0xbe   :  { %1439 = vmatprep.mubr.bf16.mxu0 %v3348_v8  ;;  %1562 = vmatprep.mubr.bf16.mxu1 %v3348_v8 }
  0xbf   :  { %1638 = vmatpush1.bf16.msra.mxu0 %v2998_v6  ;;  %1761 = vmatpush1.bf16.msra.mxu1 %v3000_v7 }
  0xc0   :  { %1639 = vmatprep.subr.bf16.mxu0 %v2983_v9  ;;  %1762 = vmatprep.subr.bf16.mxu1 %v2985_v11 }
  0xc3   :  { %1640 = vmatpush1.bf16.msra.mxu0 %v2982_v16  ;;  %1763 = vmatpush1.bf16.msra.mxu1 %v2984_v17 }
  0xc4   :  { %1641 = vmatprep.subr.bf16.mxu0 %v2967_v18  ;;  %1764 = vmatprep.subr.bf16.mxu1 %v2969_v19 }
  0xc5   :  { %1440 = vmatmul.mubr.bf16.gmra.mxu0 %v3560_v47  ;;  %1563 = vmatmul.mubr.bf16.gmra.mxu1 %v3560_v47 }
  0xc6   :  { %1449 = vmatprep.mubr.bf16.mxu0 %v3348_v8  ;;  %1572 = vmatprep.mubr.bf16.mxu1 %v3348_v8 }
  0xc7   :  { %1642 = vmatpush1.bf16.msra.mxu0 %v2966_v25  ;;  %1765 = vmatpush1.bf16.msra.mxu1 %v2968_v26 }
  0xc8   :  { %1643 = vmatprep.subr.bf16.mxu0 %v2951_v28  ;;  %1766 = vmatprep.subr.bf16.mxu1 %v2953_v30 }
  0xcb   :  { %1644 = vmatpush1.bf16.msra.mxu0 %v2950_v38  ;;  %1767 = vmatpush1.bf16.msra.mxu1 %v2952_v39 }
  0xcc   :  { %1645 = vmatprep.subr.bf16.mxu0 %v2935_v40  ;;  %1768 = vmatprep.subr.bf16.mxu1 %v2937_v41 }
  0xcd   :  { %1450 = vmatmul.mubr.bf16.gmra.mxu0 %v3596_v2  ;;  %1573 = vmatmul.mubr.bf16.gmra.mxu1 %v3596_v2 }
  0xce   :  { %1459 = vmatprep.mubr.bf16.mxu0 %v3348_v8  ;;  %1582 = vmatprep.mubr.bf16.mxu1 %v3348_v8 }
  0xcf   :  { %1646 = vmatpush1.bf16.msra.mxu0 %v2934_v46  ;;  %1769 = vmatpush1.bf16.msra.mxu1 %v2936_v48 }
  0xd0   :  { %1647 = vmatprep.subr.bf16.mxu0 %v2919_v49  ;;  %1770 = vmatprep.subr.bf16.mxu1 %v2921_v50 }
  0xd3   :  { %1648 = vmatpush1.bf16.msra.mxu0 %v2918_v51  ;;  %1771 = vmatpush1.bf16.msra.mxu1 %v2920_v52 }
  0xd5   :  { %1460 = vmatmul.mubr.bf16.gmra.mxu0 %v3642_v23  ;;  %1583 = vmatmul.mubr.bf16.gmra.mxu1 %v3642_v23 }
  0xd6   :  { %1469 = vmatprep.mubr.bf16.mxu0 %v3348_v8  ;;  %1592 = vmatprep.mubr.bf16.mxu1 %v3348_v8 }
  0xdd   :  { %1470 = vmatmul.mubr.bf16.gmra.mxu0 %v3656_v27  ;;  %1593 = vmatmul.mubr.bf16.gmra.mxu1 %v3656_v27 }
  0xde   :  { %1479 = vmatprep.mubr.bf16.mxu0 %v3348_v8  ;;  %1602 = vmatprep.mubr.bf16.mxu1 %v3348_v8 }
  0xe5   :  { %v929_v62 = vpop.f32.mrf.mxu0  ;;  %1480 = vmatmul.mubr.bf16.gmra.mxu0 %v3668_v31  ;;  %v1052_v1 = vpop.f32.mrf.mxu1  ;;  %1603 = vmatmul.mubr.bf16.gmra.mxu1 %v3668_v31 }
  0xe6   :  { %1489 = vmatprep.mubr.bf16.mxu0 %v3348_v8  ;;  %1612 = vmatprep.mubr.bf16.mxu1 %v3348_v8  ;;  %v930_v4 = vadd.f32 %v929_v62, %v3956_v60  ;;  %v1053_v7 = vadd.f32 %v1052_v1, %v3966_v63 }
  0xe7   :  { %v931_v3 = vpop.f32.mrf.mxu0  ;;  %v1054_v6 = vpop.f32.mrf.mxu1 }
  0xe8   :  { %v932_v5 = vadd.f32 %v931_v3, %v3961_v61  ;;  %v1055_v9 = vadd.f32 %v1054_v6, %v3972_v0 }
  0xe9   :  { %v933_v11 = vpop.f32.mrf.mxu0  ;;  %v1056_v13 = vpop.f32.mrf.mxu1 }
  0xea   :  { %v3178_v12 = vpack.c.bf16 %v932_v5, %v930_v4  ;;  %v3179_v14 = vpack.c.bf16 %v1055_v9, %v1053_v7  ;;  %v934_v16 = vadd.f32 %v933_v11, %v3956_v60  ;;  %v1057_v19 = vadd.f32 %v1056_v13, %v3966_v63 }
  0xeb   :  { %v935_v15 = vpop.f32.mrf.mxu0  ;;  %v1058_v18 = vpop.f32.mrf.mxu1 }
  0xec   :  { %2743 = vst [vmem:[#allocation2] sm:$0xff] %v3178_v12  ;;  %v936_v17 = vadd.f32 %v935_v15, %v3961_v61  ;;  %2744 = vst [vmem:[#allocation2 + $0x8] sm:$0xff] %v3179_v14  ;;  %v1059_v20 = vadd.f32 %v1058_v18, %v3972_v0 }
  0xed   :  { %v939_v21 = vpop.f32.mrf.mxu0  ;;  %1490 = vmatmul.mubr.bf16.gmra.mxu0 %v3680_v34  ;;  %v1062_v24 = vpop.f32.mrf.mxu1  ;;  %1613 = vmatmul.mubr.bf16.gmra.mxu1 %v3680_v34 }
  0xee   :  { %v3186_v22 = vpack.c.bf16 %v936_v17, %v934_v16  ;;  %1499 = vmatprep.mubr.bf16.mxu0 %v3348_v8  ;;  %v3187_v25 = vpack.c.bf16 %v1059_v20, %v1057_v19  ;;  %1622 = vmatprep.mubr.bf16.mxu1 %v3348_v8  ;;  %v940_v28 = vadd.f32 %v939_v21, %v3956_v60 }
  0xef   :  { %v941_v26 = vpop.f32.mrf.mxu0  ;;  %v1064_v32 = vpop.f32.mrf.mxu1  ;;  %v1063_v33 = vadd.f32 %v1062_v24, %v3966_v63 }
  0xf0   :  { %2754 = vst [vmem:[#allocation2 + $0x40] sm:$0xff] %v3186_v22  ;;  %v942_v30 = vadd.f32 %v941_v26, %v3961_v61  ;;  %2755 = vst [vmem:[#allocation2 + $0x48] sm:$0xff] %v3187_v25  ;;  %v1065_v35 = vadd.f32 %v1064_v32, %v3972_v0 }
  0xf1   :  { %v943_v36 = vpop.f32.mrf.mxu0  ;;  %v1066_v39 = vpop.f32.mrf.mxu1 }
  0xf2   :  { %v3194_v38 = vpack.c.bf16 %v942_v30, %v940_v28  ;;  %v3195_v40 = vpack.c.bf16 %v1065_v35, %v1063_v33  ;;  %v944_v42 = vadd.f32 %v943_v36, %v3956_v60  ;;  %v1067_v45 = vadd.f32 %v1066_v39, %v3966_v63 }
  0xf3   :  { %v945_v41 = vpop.f32.mrf.mxu0  ;;  %v1068_v44 = vpop.f32.mrf.mxu1 }
  0xf4   :  { %2762 = vst [vmem:[#allocation2 + $0x80] sm:$0xff] %v3194_v38  ;;  %v946_v43 = vadd.f32 %v945_v41, %v3961_v61  ;;  %2763 = vst [vmem:[#allocation2 + $0x88] sm:$0xff] %v3195_v40  ;;  %v1069_v46 = vadd.f32 %v1068_v44, %v3972_v0 }
  0xf5   :  { %v949_v48 = vpop.f32.mrf.mxu0  ;;  %1500 = vmatmul.mubr.bf16.gmra.mxu0 %v3692_v37  ;;  %v1072_v50 = vpop.f32.mrf.mxu1  ;;  %1623 = vmatmul.mubr.bf16.gmra.mxu1 %v3692_v37 }
  0xf6   :  { %v3202_v49 = vpack.c.bf16 %v946_v43, %v944_v42  ;;  %1665 = vmatprep.mubr.bf16.mxu0 %v3348_v8  ;;  %v3203_v51 = vpack.c.bf16 %v1069_v46, %v1067_v45  ;;  %1788 = vmatprep.mubr.bf16.mxu1 %v3348_v8  ;;  %v950_v53 = vadd.f32 %v949_v48, %v3956_v60 }
  0xf7   :  { %v951_v52 = vpop.f32.mrf.mxu0  ;;  %v1074_v1 = vpop.f32.mrf.mxu1  ;;  %v1073_v3 = vadd.f32 %v1072_v50, %v3966_v63 }
  0xf8   :  { %2770 = vst [vmem:[#allocation2 + $0xc0] sm:$0xff] %v3202_v49  ;;  %v952_v62 = vadd.f32 %v951_v52, %v3961_v61  ;;  %2771 = vst [vmem:[#allocation2 + $0xc8] sm:$0xff] %v3203_v51  ;;  %v1075_v4 = vadd.f32 %v1074_v1, %v3972_v0 }
  0xf9   :  { %v953_v5 = vpop.f32.mrf.mxu0  ;;  %v1076_v7 = vpop.f32.mrf.mxu1 }
  0xfa   :  { %v3210_v6 = vpack.c.bf16 %v952_v62, %v950_v53  ;;  %v3211_v9 = vpack.c.bf16 %v1075_v4, %v1073_v3  ;;  %v954_v12 = vadd.f32 %v953_v5, %v3956_v60  ;;  %v1077_v15 = vadd.f32 %v1076_v7, %v3966_v63 }
  0xfb   :  { %v955_v11 = vpop.f32.mrf.mxu0  ;;  %v1078_v14 = vpop.f32.mrf.mxu1 }
  0xfc   :  { %2778 = vst [vmem:[#allocation2 + $0x100] sm:$0xff] %v3210_v6  ;;  %v956_v13 = vadd.f32 %v955_v11, %v3961_v61  ;;  %2779 = vst [vmem:[#allocation2 + $0x108] sm:$0xff] %v3211_v9  ;;  %v1079_v16 = vadd.f32 %v1078_v14, %v3972_v0 }
  0xfd   :  { %v959_v17 = vpop.f32.mrf.mxu0  ;;  %1666 = vmatmul.mubr.bf16.vlgmr.msra.gmra.mxu0 %v3488_v10  ;;  %v1082_v19 = vpop.f32.mrf.mxu1  ;;  %1789 = vmatmul.mubr.bf16.vlgmr.msra.gmra.mxu1 %v3488_v10 }
  0xfe   :  { %v3218_v18 = vpack.c.bf16 %v956_v13, %v954_v12  ;;  %1675 = vmatprep.mubr.bf16.mxu0 %v3348_v8  ;;  %v3219_v20 = vpack.c.bf16 %v1079_v16, %v1077_v15  ;;  %1798 = vmatprep.mubr.bf16.mxu1 %v3348_v8  ;;  %v960_v22 = vadd.f32 %v959_v17, %v3956_v60 }
  0xff   :  { %v961_v21 = vpop.f32.mrf.mxu0  ;;  %v1084_v25 = vpop.f32.mrf.mxu1  ;;  %v1083_v26 = vadd.f32 %v1082_v19, %v3966_v63 }
 0x100   :  { %2786 = vst [vmem:[#allocation2 + $0x140] sm:$0xff] %v3218_v18  ;;  %v962_v24 = vadd.f32 %v961_v21, %v3961_v61  ;;  %2787 = vst [vmem:[#allocation2 + $0x148] sm:$0xff] %v3219_v20  ;;  %v1085_v28 = vadd.f32 %v1084_v25, %v3972_v0 }
 0x101   :  { %v963_v30 = vpop.f32.mrf.mxu0  ;;  %v1086_v10 = vpop.f32.mrf.mxu1 }
 0x102   :  { %v3226_v32 = vpack.c.bf16 %v962_v24, %v960_v22  ;;  %v3227_v33 = vpack.c.bf16 %v1085_v28, %v1083_v26  ;;  %v964_v36 = vadd.f32 %v963_v30, %v3956_v60  ;;  %v1087_v40 = vadd.f32 %v1086_v10, %v3966_v63 }
 0x103   :  { %v965_v35 = vpop.f32.mrf.mxu0  ;;  %v1088_v39 = vpop.f32.mrf.mxu1 }
 0x104   :  { %2794 = vst [vmem:[#allocation2 + $0x180] sm:$0xff] %v3226_v32  ;;  %v966_v38 = vadd.f32 %v965_v35, %v3961_v61  ;;  %2795 = vst [vmem:[#allocation2 + $0x188] sm:$0xff] %v3227_v33  ;;  %v1089_v41 = vadd.f32 %v1088_v39, %v3972_v0 }
 0x105   :  { %v969_v42 = vpop.f32.mrf.mxu0  ;;  %1676 = vmatmul.mubr.bf16.gmra.mxu0 %v3524_v29  ;;  %v1092_v44 = vpop.f32.mrf.mxu1  ;;  %1799 = vmatmul.mubr.bf16.gmra.mxu1 %v3524_v29 }
 0x106   :  { %v3234_v43 = vpack.c.bf16 %v966_v38, %v964_v36  ;;  %1685 = vmatprep.mubr.bf16.mxu0 %v3348_v8  ;;  %v3235_v45 = vpack.c.bf16 %v1089_v41, %v1087_v40  ;;  %1808 = vmatprep.mubr.bf16.mxu1 %v3348_v8  ;;  %v970_v48 = vadd.f32 %v969_v42, %v3956_v60 }
 0x107   :  { %v971_v46 = vpop.f32.mrf.mxu0  ;;  %v1094_v50 = vpop.f32.mrf.mxu1  ;;  %v1093_v51 = vadd.f32 %v1092_v44, %v3966_v63 }
 0x108   :  { %2802 = vst [vmem:[#allocation2 + $0x1c0] sm:$0xff] %v3234_v43  ;;  %v972_v49 = vadd.f32 %v971_v46, %v3961_v61  ;;  %2803 = vst [vmem:[#allocation2 + $0x1c8] sm:$0xff] %v3235_v45  ;;  %v1095_v52 = vadd.f32 %v1094_v50, %v3972_v0 }
 0x109   :  { %v973_v53 = vpop.f32.mrf.mxu0  ;;  %v1096_v29 = vpop.f32.mrf.mxu1 }
 0x10a   :  { %v3242_v62 = vpack.c.bf16 %v972_v49, %v970_v48  ;;  %v3243_v1 = vpack.c.bf16 %v1095_v52, %v1093_v51  ;;  %v974_v4 = vadd.f32 %v973_v53, %v3956_v60  ;;  %v1097_v7 = vadd.f32 %v1096_v29, %v3966_v63 }
 0x10b   :  { %v975_v3 = vpop.f32.mrf.mxu0  ;;  %v1098_v6 = vpop.f32.mrf.mxu1 }
 0x10c   :  { %2810 = vst [vmem:[#allocation2 + $0x200] sm:$0xff] %v3242_v62  ;;  %v976_v5 = vadd.f32 %v975_v3, %v3961_v61  ;;  %2811 = vst [vmem:[#allocation2 + $0x208] sm:$0xff] %v3243_v1  ;;  %v1099_v9 = vadd.f32 %v1098_v6, %v3972_v0 }
 0x10d   :  { %v979_v11 = vpop.f32.mrf.mxu0  ;;  %1686 = vmatmul.mubr.bf16.gmra.mxu0 %v3560_v47  ;;  %v1102_v13 = vpop.f32.mrf.mxu1  ;;  %1809 = vmatmul.mubr.bf16.gmra.mxu1 %v3560_v47 }
 0x10e   :  { %v3250_v12 = vpack.c.bf16 %v976_v5, %v974_v4  ;;  %1695 = vmatprep.mubr.bf16.mxu0 %v3348_v8  ;;  %v3251_v14 = vpack.c.bf16 %v1099_v9, %v1097_v7  ;;  %1818 = vmatprep.mubr.bf16.mxu1 %v3348_v8  ;;  %v980_v16 = vadd.f32 %v979_v11, %v3956_v60 }
 0x10f   :  { %v981_v15 = vpop.f32.mrf.mxu0  ;;  %v1104_v18 = vpop.f32.mrf.mxu1  ;;  %v1103_v19 = vadd.f32 %v1102_v13, %v3966_v63 }
 0x110   :  { %2818 = vst [vmem:[#allocation2 + $0x240] sm:$0xff] %v3250_v12  ;;  %v982_v17 = vadd.f32 %v981_v15, %v3961_v61  ;;  %2819 = vst [vmem:[#allocation2 + $0x248] sm:$0xff] %v3251_v14  ;;  %v1105_v20 = vadd.f32 %v1104_v18, %v3972_v0 }
 0x111   :  { %v983_v21 = vpop.f32.mrf.mxu0  ;;  %v1106_v47 = vpop.f32.mrf.mxu1 }
 0x112   :  { %v3258_v22 = vpack.c.bf16 %v982_v17, %v980_v16  ;;  %v3259_v24 = vpack.c.bf16 %v1105_v20, %v1103_v19  ;;  %v984_v26 = vadd.f32 %v983_v21, %v3956_v60  ;;  %v1107_v32 = vadd.f32 %v1106_v47, %v3966_v63 }
 0x113   :  { %v985_v25 = vpop.f32.mrf.mxu0  ;;  %v1108_v30 = vpop.f32.mrf.mxu1 }
 0x114   :  { %2826 = vst [vmem:[#allocation2 + $0x280] sm:$0xff] %v3258_v22  ;;  %v986_v28 = vadd.f32 %v985_v25, %v3961_v61  ;;  %2827 = vst [vmem:[#allocation2 + $0x288] sm:$0xff] %v3259_v24  ;;  %v1109_v10 = vadd.f32 %v1108_v30, %v3972_v0 }
 0x115   :  { %v989_v33 = vpop.f32.mrf.mxu0  ;;  %1696 = vmatmul.mubr.bf16.gmra.mxu0 %v3596_v2  ;;  %v1112_v36 = vpop.f32.mrf.mxu1  ;;  %1819 = vmatmul.mubr.bf16.gmra.mxu1 %v3596_v2 }
 0x116   :  { %v3266_v35 = vpack.c.bf16 %v986_v28, %v984_v26  ;;  %1705 = vmatprep.mubr.bf16.mxu0 %v3348_v8  ;;  %v3267_v38 = vpack.c.bf16 %v1109_v10, %v1107_v32  ;;  %1828 = vmatprep.mubr.bf16.mxu1 %v3348_v8  ;;  %v990_v40 = vadd.f32 %v989_v33, %v3956_v60  ;;  %v193_v10 = vsub.s32 4, %v3938_v54 }
 0x117   :  { %v991_v39 = vpop.f32.mrf.mxu0  ;;  %v1114_v42 = vpop.f32.mrf.mxu1  ;;  %v1113_v43 = vadd.f32 %v1112_v36, %v3966_v63  ;;  %v197_v33 = vsub.s32 5, %v3938_v54 }
 0x118   :  { %2834 = vst [vmem:[#allocation2 + $0x2c0] sm:$0xff] %v3266_v35  ;;  %v992_v41 = vadd.f32 %v991_v39, %v3961_v61  ;;  %2835 = vst [vmem:[#allocation2 + $0x2c8] sm:$0xff] %v3267_v38  ;;  %v1115_v44 = vadd.f32 %v1114_v42, %v3972_v0  ;;  %v201_v38 = vsub.s32 6, %v3938_v54  ;;  %v205_v39 = vsub.s32 7, %v3938_v54 }
 0x119   :  { %v993_v45 = vpop.f32.mrf.mxu0  ;;  %v1116_v2 = vpop.f32.mrf.mxu1 }
 0x11a   :  { %v3274_v46 = vpack.c.bf16 %v992_v41, %v990_v40  ;;  %v3275_v48 = vpack.c.bf16 %v1115_v44, %v1113_v43  ;;  %v994_v50 = vadd.f32 %v993_v45, %v3956_v60  ;;  %v1117_v53 = vadd.f32 %v1116_v2, %v3966_v63 }
 0x11b   :  { %v995_v49 = vpop.f32.mrf.mxu0  ;;  %v1118_v52 = vpop.f32.mrf.mxu1  ;;  %v4086_v2 = vrot.slane %v3949_v57, %v193_v10 }
 0x11c   :  { %2842 = vst [vmem:[#allocation2 + $0x300] sm:$0xff] %v3274_v46  ;;  %v996_v51 = vadd.f32 %v995_v49, %v3961_v61  ;;  %2843 = vst [vmem:[#allocation2 + $0x308] sm:$0xff] %v3275_v48  ;;  %v1119_v62 = vadd.f32 %v1118_v52, %v3972_v0  ;;  %v4091_v48 = vrot.slane %v3949_v57, %v197_v33 }
 0x11d   :  { %v999_v29 = vpop.f32.mrf.mxu0  ;;  %1706 = vmatmul.mubr.bf16.gmra.mxu0 %v3642_v23  ;;  %v1122_v3 = vpop.f32.mrf.mxu1  ;;  %1829 = vmatmul.mubr.bf16.gmra.mxu1 %v3642_v23 }
 0x11e   :  { %v3282_v1 = vpack.c.bf16 %v996_v51, %v994_v50  ;;  %1715 = vmatprep.mubr.bf16.mxu0 %v3348_v8  ;;  %v3283_v4 = vpack.c.bf16 %v1119_v62, %v1117_v53  ;;  %1838 = vmatprep.mubr.bf16.mxu1 %v3348_v8  ;;  %v1000_v6 = vadd.f32 %v999_v29, %v3956_v60 }
 0x11f   :  { %v1001_v5 = vpop.f32.mrf.mxu0  ;;  %v1124_v9 = vpop.f32.mrf.mxu1  ;;  %v1123_v11 = vadd.f32 %v1122_v3, %v3966_v63 }
 0x120   :  { %2850 = vst [vmem:[#allocation2 + $0x340] sm:$0xff] %v3282_v1  ;;  %v1002_v7 = vadd.f32 %v1001_v5, %v3961_v61  ;;  %2851 = vst [vmem:[#allocation2 + $0x348] sm:$0xff] %v3283_v4  ;;  %v1125_v12 = vadd.f32 %v1124_v9, %v3972_v0 }
 0x121   :  { %v1003_v13 = vpop.f32.mrf.mxu0  ;;  %v1126_v23 = vpop.f32.mrf.mxu1 }
 0x122   :  { %v3290_v14 = vpack.c.bf16 %v1002_v7, %v1000_v6  ;;  %v3291_v15 = vpack.c.bf16 %v1125_v12, %v1123_v11  ;;  %v1004_v17 = vadd.f32 %v1003_v13, %v3956_v60  ;;  %v1127_v20 = vadd.f32 %v1126_v23, %v3966_v63 }
 0x123   :  { %v1005_v16 = vpop.f32.mrf.mxu0  ;;  %v1128_v19 = vpop.f32.mrf.mxu1 }
 0x124   :  { %2858 = vst [vmem:[#allocation2 + $0x380] sm:$0xff] %v3290_v14  ;;  %v1006_v18 = vadd.f32 %v1005_v16, %v3961_v61  ;;  %2859 = vst [vmem:[#allocation2 + $0x388] sm:$0xff] %v3291_v15  ;;  %v1129_v21 = vadd.f32 %v1128_v19, %v3972_v0 }
 0x125   :  { %v1009_v22 = vpop.f32.mrf.mxu0  ;;  %1716 = vmatmul.mubr.bf16.gmra.mxu0 %v3656_v27  ;;  %v1132_v24 = vpop.f32.mrf.mxu1  ;;  %1839 = vmatmul.mubr.bf16.gmra.mxu1 %v3656_v27 }
 0x126   :  { %v3298_v47 = vpack.c.bf16 %v1006_v18, %v1004_v17  ;;  %1725 = vmatprep.mubr.bf16.mxu0 %v3348_v8  ;;  %v3299_v25 = vpack.c.bf16 %v1129_v21, %v1127_v20  ;;  %1848 = vmatprep.mubr.bf16.mxu1 %v3348_v8  ;;  %v1010_v28 = vadd.f32 %v1009_v22, %v3956_v60 }
 0x127   :  { %v1011_v26 = vpop.f32.mrf.mxu0  ;;  %v1134_v32 = vpop.f32.mrf.mxu1  ;;  %v1133_v35 = vadd.f32 %v1132_v24, %v3966_v63 }
 0x128   :  { %2866 = vst [vmem:[#allocation2 + $0x3c0] sm:$0xff] %v3298_v47  ;;  %v1012_v30 = vadd.f32 %v1011_v26, %v3961_v61  ;;  %2867 = vst [vmem:[#allocation2 + $0x3c8] sm:$0xff] %v3299_v25  ;;  %v1135_v27 = vadd.f32 %v1134_v32, %v3972_v0 }
 0x129   :  { %v1013_v36 = vpop.f32.mrf.mxu0  ;;  %v1136_v41 = vpop.f32.mrf.mxu1 }
 0x12a   :  { %v3306_v40 = vpack.c.bf16 %v1012_v30, %v1010_v28  ;;  %v3307_v42 = vpack.c.bf16 %v1135_v27, %v1133_v35  ;;  %v1014_v44 = vadd.f32 %v1013_v36, %v3956_v60  ;;  %v1137_v49 = vadd.f32 %v1136_v41, %v3966_v63 }
 0x12b   :  { %v1015_v43 = vpop.f32.mrf.mxu0  ;;  %v1138_v46 = vpop.f32.mrf.mxu1  ;;  %v4098_v60 = vrot.slane %v3949_v57, %v201_v38 }
 0x12c   :  { %2874 = vst [vmem:[#allocation2 + $0x400] sm:$0xff] %v3306_v40  ;;  %v1016_v45 = vadd.f32 %v1015_v43, %v3961_v61  ;;  %2875 = vst [vmem:[#allocation2 + $0x408] sm:$0xff] %v3307_v42  ;;  %v1139_v50 = vadd.f32 %v1138_v46, %v3972_v0  ;;  %v4104_v61 = vrot.slane %v3949_v57, %v205_v39 }
 0x12d   :  { %v1175_v51 = vpop.f32.mrf.mxu0  ;;  %1726 = vmatmul.mubr.bf16.gmra.mxu0 %v3668_v31  ;;  %v1298_v53 = vpop.f32.mrf.mxu1  ;;  %1849 = vmatmul.mubr.bf16.gmra.mxu1 %v3668_v31 }
 0x12e   :  { %v3314_v52 = vpack.c.bf16 %v1016_v45, %v1014_v44  ;;  %1735 = vmatprep.mubr.bf16.mxu0 %v3348_v8  ;;  %v3315_v63 = vpack.c.bf16 %v1139_v50, %v1137_v49  ;;  %1858 = vmatprep.mubr.bf16.mxu1 %v3348_v8  ;;  %v1176_v62 = vadd.f32 %v1175_v51, %v4086_v2 }
 0x12f   :  { %v1177_v0 = vpop.f32.mrf.mxu0  ;;  %v1300_v1 = vpop.f32.mrf.mxu1  ;;  %v1299_v57 = vadd.f32 %v1298_v53, %v4098_v60 }
 0x130   :  { %2882 = vst [vmem:[#allocation2 + $0x440] sm:$0xff] %v3314_v52  ;;  %v1178_v29 = vadd.f32 %v1177_v0, %v4091_v48  ;;  %2883 = vst [vmem:[#allocation2 + $0x448] sm:$0xff] %v3315_v63  ;;  %v1301_v3 = vadd.f32 %v1300_v1, %v4104_v61 }
 0x131   :  { %v1179_v4 = vpop.f32.mrf.mxu0  ;;  %v1302_v31 = vpop.f32.mrf.mxu1 }
 0x132   :  { %v3180_v5 = vpack.c.bf16 %v1178_v29, %v1176_v62  ;;  %v3181_v6 = vpack.c.bf16 %v1301_v3, %v1299_v57  ;;  %v1180_v9 = vadd.f32 %v1179_v4, %v4086_v2  ;;  %v1303_v13 = vadd.f32 %v1302_v31, %v4098_v60 }
 0x133   :  { %v1181_v7 = vpop.f32.mrf.mxu0  ;;  %v1304_v12 = vpop.f32.mrf.mxu1 }
 0x134   :  { %2745 = vst [vmem:[#allocation2 + $0x10] sm:$0xff] %v3180_v5  ;;  %v1182_v11 = vadd.f32 %v1181_v7, %v4091_v48  ;;  %2746 = vst [vmem:[#allocation2 + $0x18] sm:$0xff] %v3181_v6  ;;  %v1305_v14 = vadd.f32 %v1304_v12, %v4104_v61 }
 0x135   :  { %v1185_v23 = vpop.f32.mrf.mxu0  ;;  %1736 = vmatmul.mubr.bf16.gmra.mxu0 %v3680_v34  ;;  %v1308_v16 = vpop.f32.mrf.mxu1  ;;  %1859 = vmatmul.mubr.bf16.gmra.mxu1 %v3680_v34 }
 0x136   :  { %v3188_v15 = vpack.c.bf16 %v1182_v11, %v1180_v9  ;;  %1745 = vmatprep.mubr.bf16.mxu0 %v3348_v8  ;;  %v3189_v17 = vpack.c.bf16 %v1305_v14, %v1303_v13  ;;  %1868 = vmatprep.mubr.bf16.mxu1 %v3348_v8  ;;  %v1186_v19 = vadd.f32 %v1185_v23, %v4086_v2 }
 0x137   :  { %v1187_v18 = vpop.f32.mrf.mxu0  ;;  %v1310_v21 = vpop.f32.mrf.mxu1  ;;  %v1309_v22 = vadd.f32 %v1308_v16, %v4098_v60 }
 0x138   :  { %2756 = vst [vmem:[#allocation2 + $0x50] sm:$0xff] %v3188_v15  ;;  %v1188_v20 = vadd.f32 %v1187_v18, %v4091_v48  ;;  %2757 = vst [vmem:[#allocation2 + $0x58] sm:$0xff] %v3189_v17  ;;  %v1311_v47 = vadd.f32 %v1310_v21, %v4104_v61 }
 0x139   :  { %v1189_v24 = vpop.f32.mrf.mxu0  ;;  %v1312_v34 = vpop.f32.mrf.mxu1 }
 0x13a   :  { %v3196_v25 = vpack.c.bf16 %v1188_v20, %v1186_v19  ;;  %v3197_v26 = vpack.c.bf16 %v1311_v47, %v1309_v22  ;;  %v1190_v30 = vadd.f32 %v1189_v24, %v4086_v2  ;;  %v1313_v35 = vadd.f32 %v1312_v34, %v4098_v60 }
 0x13b   :  { %v1191_v28 = vpop.f32.mrf.mxu0  ;;  %v1314_v32 = vpop.f32.mrf.mxu1 }
 0x13c   :  { %2764 = vst [vmem:[#allocation2 + $0x90] sm:$0xff] %v3196_v25  ;;  %v1192_v8 = vadd.f32 %v1191_v28, %v4091_v48  ;;  %2765 = vst [vmem:[#allocation2 + $0x98] sm:$0xff] %v3197_v26  ;;  %v1315_v27 = vadd.f32 %v1314_v32, %v4104_v61 }
 0x13d   :  { %v1195_v36 = vpop.f32.mrf.mxu0  ;;  %1746 = vmatmul.mubr.bf16.gmra.mxu0 %v3692_v37  ;;  %v1318_v41 = vpop.f32.mrf.mxu1  ;;  %1869 = vmatmul.mubr.bf16.gmra.mxu1 %v3692_v37 }
 0x13e   :  { %v3204_v40 = vpack.c.bf16 %v1192_v8, %v1190_v30  ;;  %v3205_v42 = vpack.c.bf16 %v1315_v27, %v1313_v35  ;;  %v1196_v44 = vadd.f32 %v1195_v36, %v4086_v2  ;;  %v1319_v49 = vadd.f32 %v1318_v41, %v4098_v60 }
 0x13f   :  { %v1197_v43 = vpop.f32.mrf.mxu0  ;;  %v1320_v46 = vpop.f32.mrf.mxu1 }
 0x140   :  { %2772 = vst [vmem:[#allocation2 + $0xd0] sm:$0xff] %v3204_v40  ;;  %v1198_v45 = vadd.f32 %v1197_v43, %v4091_v48  ;;  %2773 = vst [vmem:[#allocation2 + $0xd8] sm:$0xff] %v3205_v42  ;;  %v1321_v50 = vadd.f32 %v1320_v46, %v4104_v61 }
 0x141   :  { %v1199_v51 = vpop.f32.mrf.mxu0  ;;  %v1322_v53 = vpop.f32.mrf.mxu1 }
 0x142   :  { %v3212_v52 = vpack.c.bf16 %v1198_v45, %v1196_v44  ;;  %v3213_v63 = vpack.c.bf16 %v1321_v50, %v1319_v49  ;;  %v1200_v37 = vadd.f32 %v1199_v51, %v4086_v2  ;;  %v1323_v1 = vadd.f32 %v1322_v53, %v4098_v60 }
 0x143   :  { %v1201_v0 = vpop.f32.mrf.mxu0  ;;  %v1324_v29 = vpop.f32.mrf.mxu1 }
 0x144   :  { %2780 = vst [vmem:[#allocation2 + $0x110] sm:$0xff] %v3212_v52  ;;  %v1202_v62 = vadd.f32 %v1201_v0, %v4091_v48  ;;  %2781 = vst [vmem:[#allocation2 + $0x118] sm:$0xff] %v3213_v63  ;;  %v1325_v57 = vadd.f32 %v1324_v29, %v4104_v61 }
 0x145   :  { %v1205_v3 = vpop.f32.mrf.mxu0  ;;  %v1328_v5 = vpop.f32.mrf.mxu1 }
 0x146   :  { %v3220_v4 = vpack.c.bf16 %v1202_v62, %v1200_v37  ;;  %v3221_v31 = vpack.c.bf16 %v1325_v57, %v1323_v1  ;;  %v1206_v7 = vadd.f32 %v1205_v3, %v4086_v2  ;;  %v1329_v12 = vadd.f32 %v1328_v5, %v4098_v60 }
 0x147   :  { %v1207_v6 = vpop.f32.mrf.mxu0  ;;  %v1330_v11 = vpop.f32.mrf.mxu1 }
 0x148   :  { %2788 = vst [vmem:[#allocation2 + $0x150] sm:$0xff] %v3220_v4  ;;  %v1208_v9 = vadd.f32 %v1207_v6, %v4091_v48  ;;  %2789 = vst [vmem:[#allocation2 + $0x158] sm:$0xff] %v3221_v31  ;;  %v1331_v13 = vadd.f32 %v1330_v11, %v4104_v61 }
 0x149   :  { %v1209_v14 = vpop.f32.mrf.mxu0  ;;  %v1332_v15 = vpop.f32.mrf.mxu1 }
 0x14a   :  { %v3228_v23 = vpack.c.bf16 %v1208_v9, %v1206_v7  ;;  %v3229_v16 = vpack.c.bf16 %v1331_v13, %v1329_v12  ;;  %v1210_v18 = vadd.f32 %v1209_v14, %v4086_v2  ;;  %v1333_v21 = vadd.f32 %v1332_v15, %v4098_v60 }
 0x14b   :  { %v1211_v17 = vpop.f32.mrf.mxu0  ;;  %v1334_v20 = vpop.f32.mrf.mxu1 }
 0x14c   :  { %2796 = vst [vmem:[#allocation2 + $0x190] sm:$0xff] %v3228_v23  ;;  %v1212_v19 = vadd.f32 %v1211_v17, %v4091_v48  ;;  %2797 = vst [vmem:[#allocation2 + $0x198] sm:$0xff] %v3229_v16  ;;  %v1335_v22 = vadd.f32 %v1334_v20, %v4104_v61 }
 0x14d   :  { %v1215_v47 = vpop.f32.mrf.mxu0  ;;  %v1338_v25 = vpop.f32.mrf.mxu1 }
 0x14e   :  { %v3236_v24 = vpack.c.bf16 %v1212_v19, %v1210_v18  ;;  %v3237_v34 = vpack.c.bf16 %v1335_v22, %v1333_v21  ;;  %v1216_v28 = vadd.f32 %v1215_v47, %v4086_v2  ;;  %v1339_v32 = vadd.f32 %v1338_v25, %v4098_v60 }
 0x14f   :  { %v1217_v26 = vpop.f32.mrf.mxu0  ;;  %v1340_v8 = vpop.f32.mrf.mxu1 }
 0x150   :  { %2804 = vst [vmem:[#allocation2 + $0x1d0] sm:$0xff] %v3236_v24  ;;  %v1218_v30 = vadd.f32 %v1217_v26, %v4091_v48  ;;  %2805 = vst [vmem:[#allocation2 + $0x1d8] sm:$0xff] %v3237_v34  ;;  %v1341_v35 = vadd.f32 %v1340_v8, %v4104_v61 }
 0x151   :  { %v1219_v27 = vpop.f32.mrf.mxu0  ;;  %v1342_v40 = vpop.f32.mrf.mxu1 }
 0x152   :  { %v3244_v36 = vpack.c.bf16 %v1218_v30, %v1216_v28  ;;  %v3245_v41 = vpack.c.bf16 %v1341_v35, %v1339_v32  ;;  %v1220_v43 = vadd.f32 %v1219_v27, %v4086_v2  ;;  %v1343_v46 = vadd.f32 %v1342_v40, %v4098_v60 }
 0x153   :  { %v1221_v42 = vpop.f32.mrf.mxu0  ;;  %v1344_v45 = vpop.f32.mrf.mxu1 }
 0x154   :  { %2812 = vst [vmem:[#allocation2 + $0x210] sm:$0xff] %v3244_v36  ;;  %v1222_v44 = vadd.f32 %v1221_v42, %v4091_v48  ;;  %2813 = vst [vmem:[#allocation2 + $0x218] sm:$0xff] %v3245_v41  ;;  %v1345_v49 = vadd.f32 %v1344_v45, %v4104_v61 }
 0x155   :  { %v1225_v50 = vpop.f32.mrf.mxu0  ;;  %v1348_v52 = vpop.f32.mrf.mxu1 }
 0x156   :  { %v3252_v51 = vpack.c.bf16 %v1222_v44, %v1220_v43  ;;  %v3253_v53 = vpack.c.bf16 %v1345_v49, %v1343_v46  ;;  %v1226_v0 = vadd.f32 %v1225_v50, %v4086_v2  ;;  %v1349_v29 = vadd.f32 %v1348_v52, %v4098_v60 }
 0x157   :  { %v1227_v63 = vpop.f32.mrf.mxu0  ;;  %v1350_v62 = vpop.f32.mrf.mxu1 }
 0x158   :  { %2820 = vst [vmem:[#allocation2 + $0x250] sm:$0xff] %v3252_v51  ;;  %v1228_v37 = vadd.f32 %v1227_v63, %v4091_v48  ;;  %2821 = vst [vmem:[#allocation2 + $0x258] sm:$0xff] %v3253_v53  ;;  %v1351_v1 = vadd.f32 %v1350_v62, %v4104_v61 }
 0x159   :  { %v1229_v57 = vpop.f32.mrf.mxu0  ;;  %v1352_v4 = vpop.f32.mrf.mxu1 }
 0x15a   :  { %v3260_v3 = vpack.c.bf16 %v1228_v37, %v1226_v0  ;;  %v3261_v5 = vpack.c.bf16 %v1351_v1, %v1349_v29  ;;  %v1230_v6 = vadd.f32 %v1229_v57, %v4086_v2  ;;  %v1353_v11 = vadd.f32 %v1352_v4, %v4098_v60 }
 0x15b   :  { %v1231_v31 = vpop.f32.mrf.mxu0  ;;  %v1354_v9 = vpop.f32.mrf.mxu1 }
 0x15c   :  { %2828 = vst [vmem:[#allocation2 + $0x290] sm:$0xff] %v3260_v3  ;;  %v1232_v7 = vadd.f32 %v1231_v31, %v4091_v48  ;;  %2829 = vst [vmem:[#allocation2 + $0x298] sm:$0xff] %v3261_v5  ;;  %v1355_v12 = vadd.f32 %v1354_v9, %v4104_v61 }
 0x15d   :  { %v1235_v13 = vpop.f32.mrf.mxu0  ;;  %v1358_v23 = vpop.f32.mrf.mxu1 }
 0x15e   :  { %v3268_v14 = vpack.c.bf16 %v1232_v7, %v1230_v6  ;;  %v3269_v15 = vpack.c.bf16 %v1355_v12, %v1353_v11  ;;  %v1236_v17 = vadd.f32 %v1235_v13, %v4086_v2  ;;  %v1359_v20 = vadd.f32 %v1358_v23, %v4098_v60  ;;  %v4186_v13 = vld [vmem:[%s4421_s2 + $0x8] sm:$0xff]  ;;  %s3349_s2 = smov [#allocation2]  }
 0x15f   :  { %v1237_v16 = vpop.f32.mrf.mxu0  ;;  %v1360_v19 = vpop.f32.mrf.mxu1  ;;  %s2895_s5 = sshll.u32 %s3349_s2, 4  ;;  %s2896_s5 = int_to_ptr.vmem [resolvable:$true] %s2895_s5 }
 0x160   :  { %2836 = vst [vmem:[#allocation2 + $0x2d0] sm:$0xff] %v3268_v14  ;;  %v1238_v18 = vadd.f32 %v1237_v16, %v4091_v48  ;;  %2837 = vst [vmem:[#allocation2 + $0x2d8] sm:$0xff] %v3269_v15  ;;  %v1361_v21 = vadd.f32 %v1360_v19, %v4104_v61  ;;  %s3326_s6 = scalar_lea.vmem %s2896_s5, 18432  ;;  %p3331_p1 = scmp.lt.s32.totalorder %s2896_s5, %s2896_s5 }
 0x161   :  { %v1239_v22 = vpop.f32.mrf.mxu0  ;;  %v1362_v24 = vpop.f32.mrf.mxu1  ;;  %p3327_p0 = scmp.ne.s32.totalorder %s2896_s5, %s3326_s6  ;;  %p3332_p2 = scmp.lt.s32.totalorder %s3326_s6, %s3326_s6 }
 0x162   :  { %v3276_v47 = vpack.c.bf16 %v1238_v18, %v1236_v17  ;;  %v3277_v25 = vpack.c.bf16 %v1361_v21, %v1359_v20  ;;  %v1240_v26 = vadd.f32 %v1239_v22, %v4086_v2  ;;  %v1363_v8 = vadd.f32 %v1362_v24, %v4098_v60 }
 0x163   :  { %v1241_v34 = vpop.f32.mrf.mxu0  ;;  %v1364_v30 = vpop.f32.mrf.mxu1  ;;  %v4193_v20 = vrot.slane %v4186_v13, %v177_v55  ;;  %v4198_v21 = vrot.slane %v4186_v13, %v181_v56  ;;  %v4210_v55 = vrot.slane %v4186_v13, %v189_v59  ;;  %p3333_p3 = por %p3332_p2, %p3331_p1 }
 0x164   :  { %2844 = vst [vmem:[#allocation2 + $0x310] sm:$0xff] %v3276_v47  ;;  %v1242_v28 = vadd.f32 %v1241_v34, %v4091_v48  ;;  %2845 = vst [vmem:[#allocation2 + $0x318] sm:$0xff] %v3277_v25  ;;  %v1365_v32 = vadd.f32 %v1364_v30, %v4104_v61 }
 0x165   :  { %v1245_v35 = vpop.f32.mrf.mxu0  ;;  %v1368_v36 = vpop.f32.mrf.mxu1  ;;  %p3334_p4 = pnand %p3333_p3, %p3327_p0 }
 0x166   :  { %v3284_v27 = vpack.c.bf16 %v1242_v28, %v1240_v26  ;;  %v3285_v40 = vpack.c.bf16 %v1365_v32, %v1363_v8  ;;  %v1246_v42 = vadd.f32 %v1245_v35, %v4086_v2  ;;  %v1369_v45 = vadd.f32 %v1368_v36, %v4098_v60 }
 0x167   :  { %v1247_v41 = vpop.f32.mrf.mxu0  ;;  %v1370_v44 = vpop.f32.mrf.mxu1 }
 0x168   :  { %2852 = vst [vmem:[#allocation2 + $0x350] sm:$0xff] %v3284_v27  ;;  %v1248_v43 = vadd.f32 %v1247_v41, %v4091_v48  ;;  %2853 = vst [vmem:[#allocation2 + $0x358] sm:$0xff] %v3285_v40  ;;  %v1371_v46 = vadd.f32 %v1370_v44, %v4104_v61 }
 0x169   :  { %v1249_v49 = vpop.f32.mrf.mxu0  ;;  %v1372_v51 = vpop.f32.mrf.mxu1 }
 0x16a   :  { %v3292_v50 = vpack.c.bf16 %v1248_v43, %v1246_v42  ;;  %v3293_v52 = vpack.c.bf16 %v1371_v46, %v1369_v45  ;;  %v1250_v63 = vadd.f32 %v1249_v49, %v4086_v2  ;;  %v1373_v62 = vadd.f32 %v1372_v51, %v4098_v60 }
 0x16b   :  { %v1251_v53 = vpop.f32.mrf.mxu0  ;;  %v1374_v37 = vpop.f32.mrf.mxu1 }
 0x16c   :  { %2860 = vst [vmem:[#allocation2 + $0x390] sm:$0xff] %v3292_v50  ;;  %v1252_v0 = vadd.f32 %v1251_v53, %v4091_v48  ;;  %2861 = vst [vmem:[#allocation2 + $0x398] sm:$0xff] %v3293_v52  ;;  %v1375_v29 = vadd.f32 %v1374_v37, %v4104_v61 }
 0x16d   :  { %v1255_v1 = vpop.f32.mrf.mxu0  ;;  %v1378_v3 = vpop.f32.mrf.mxu1 }
 0x16e   :  { %v3300_v57 = vpack.c.bf16 %v1252_v0, %v1250_v63  ;;  %v3301_v4 = vpack.c.bf16 %v1375_v29, %v1373_v62  ;;  %v1256_v31 = vadd.f32 %v1255_v1, %v4086_v2  ;;  %v1379_v9 = vadd.f32 %v1378_v3, %v4098_v60 }
 0x16f   :  { %v1257_v5 = vpop.f32.mrf.mxu0  ;;  %v1380_v7 = vpop.f32.mrf.mxu1 }
 0x170   :  { %2868 = vst [vmem:[#allocation2 + $0x3d0] sm:$0xff] %v3300_v57  ;;  %v1258_v6 = vadd.f32 %v1257_v5, %v4091_v48  ;;  %2869 = vst [vmem:[#allocation2 + $0x3d8] sm:$0xff] %v3301_v4  ;;  %v1381_v11 = vadd.f32 %v1380_v7, %v4104_v61 }
 0x171   :  { %v1259_v12 = vpop.f32.mrf.mxu0  ;;  %v1382_v23 = vpop.f32.mrf.mxu1 }
 0x172   :  { %v3308_v14 = vpack.c.bf16 %v1258_v6, %v1256_v31  ;;  %v3309_v15 = vpack.c.bf16 %v1381_v11, %v1379_v9  ;;  %v1260_v17 = vadd.f32 %v1259_v12, %v4086_v2  ;;  %v1383_v22 = vadd.f32 %v1382_v23, %v4098_v60 }
 0x173   :  { %v1261_v16 = vpop.f32.mrf.mxu0  ;;  %v1384_v19 = vpop.f32.mrf.mxu1  ;;  %v4205_v2 = vrot.slane %v4186_v13, %v185_v58 }
 0x174   :  { %2876 = vst [vmem:[#allocation2 + $0x410] sm:$0xff] %v3308_v14  ;;  %v1262_v18 = vadd.f32 %v1261_v16, %v4091_v48  ;;  %2877 = vst [vmem:[#allocation2 + $0x418] sm:$0xff] %v3309_v15  ;;  %v1385_v47 = vadd.f32 %v1384_v19, %v4104_v61 }
 0x175   :  { %v1421_v24 = vpop.f32.mrf.mxu0  ;;  %v1544_v25 = vpop.f32.mrf.mxu1 }
 0x176   :  { %v3316_v48 = vpack.c.bf16 %v1262_v18, %v1260_v17  ;;  %v3317_v56 = vpack.c.bf16 %v1385_v47, %v1383_v22  ;;  %v1422_v60 = vadd.f32 %v1421_v24, %v4193_v20  ;;  %v1545_v28 = vadd.f32 %v1544_v25, %v4205_v2 }
 0x177   :  { %v1423_v34 = vpop.f32.mrf.mxu0  ;;  %v1546_v26 = vpop.f32.mrf.mxu1 }
 0x178   :  { %2884 = vst [vmem:[#allocation2 + $0x450] sm:$0xff] %v3316_v48  ;;  %v1424_v61 = vadd.f32 %v1423_v34, %v4198_v21  ;;  %2885 = vst [vmem:[#allocation2 + $0x458] sm:$0xff] %v3317_v56  ;;  %v1547_v58 = vadd.f32 %v1546_v26, %v4210_v55 }
 0x179   :  { %v1425_v30 = vpop.f32.mrf.mxu0  ;;  %v1548_v32 = vpop.f32.mrf.mxu1 }
 0x17a   :  { %v3182_v8 = vpack.c.bf16 %v1424_v61, %v1422_v60  ;;  %v3183_v59 = vpack.c.bf16 %v1547_v58, %v1545_v28  ;;  %v1426_v27 = vadd.f32 %v1425_v30, %v4193_v20  ;;  %v1549_v41 = vadd.f32 %v1548_v32, %v4205_v2 }
 0x17b   :  { %v1427_v35 = vpop.f32.mrf.mxu0  ;;  %v1550_v40 = vpop.f32.mrf.mxu1 }
 0x17c   :  { %2747 = vst [vmem:[#allocation2 + $0x20] sm:$0xff] %v3182_v8  ;;  %v1428_v36 = vadd.f32 %v1427_v35, %v4198_v21  ;;  %2748 = vst [vmem:[#allocation2 + $0x28] sm:$0xff] %v3183_v59  ;;  %v1551_v42 = vadd.f32 %v1550_v40, %v4210_v55 }
 0x17d   :  { %v1431_v43 = vpop.f32.mrf.mxu0  ;;  %v1554_v45 = vpop.f32.mrf.mxu1 }
 0x17e   :  { %v3190_v44 = vpack.c.bf16 %v1428_v36, %v1426_v27  ;;  %v3191_v46 = vpack.c.bf16 %v1551_v42, %v1549_v41  ;;  %v1432_v50 = vadd.f32 %v1431_v43, %v4193_v20  ;;  %v1555_v53 = vadd.f32 %v1554_v45, %v4205_v2 }
 0x17f   :  { %v1433_v49 = vpop.f32.mrf.mxu0  ;;  %v1556_v52 = vpop.f32.mrf.mxu1 }
 0x180   :  { %2758 = vst [vmem:[#allocation2 + $0x60] sm:$0xff] %v3190_v44  ;;  %v1434_v51 = vadd.f32 %v1433_v49, %v4198_v21  ;;  %2759 = vst [vmem:[#allocation2 + $0x68] sm:$0xff] %v3191_v46  ;;  %v1557_v63 = vadd.f32 %v1556_v52, %v4210_v55 }
 0x181   :  { %v1435_v0 = vpop.f32.mrf.mxu0  ;;  %v1558_v62 = vpop.f32.mrf.mxu1 }
 0x182   :  { %v3198_v37 = vpack.c.bf16 %v1434_v51, %v1432_v50  ;;  %v3199_v29 = vpack.c.bf16 %v1557_v63, %v1555_v53  ;;  %v1436_v57 = vadd.f32 %v1435_v0, %v4193_v20  ;;  %v1559_v5 = vadd.f32 %v1558_v62, %v4205_v2 }
 0x183   :  { %v1437_v1 = vpop.f32.mrf.mxu0  ;;  %v1560_v4 = vpop.f32.mrf.mxu1 }
 0x184   :  { %2766 = vst [vmem:[#allocation2 + $0xa0] sm:$0xff] %v3198_v37  ;;  %v1438_v3 = vadd.f32 %v1437_v1, %v4198_v21  ;;  %2767 = vst [vmem:[#allocation2 + $0xa8] sm:$0xff] %v3199_v29  ;;  %v1561_v31 = vadd.f32 %v1560_v4, %v4210_v55 }
 0x185   :  { %v1441_v6 = vpop.f32.mrf.mxu0  ;;  %v1564_v9 = vpop.f32.mrf.mxu1 }
 0x186   :  { %v3206_v7 = vpack.c.bf16 %v1438_v3, %v1436_v57  ;;  %v3207_v11 = vpack.c.bf16 %v1561_v31, %v1559_v5  ;;  %v1442_v14 = vadd.f32 %v1441_v6, %v4193_v20  ;;  %v1565_v16 = vadd.f32 %v1564_v9, %v4205_v2 }
 0x187   :  { %v1443_v12 = vpop.f32.mrf.mxu0  ;;  %v1566_v15 = vpop.f32.mrf.mxu1 }
 0x188   :  { %2774 = vst [vmem:[#allocation2 + $0xe0] sm:$0xff] %v3206_v7  ;;  %v1444_v23 = vadd.f32 %v1443_v12, %v4198_v21  ;;  %2775 = vst [vmem:[#allocation2 + $0xe8] sm:$0xff] %v3207_v11  ;;  %v1567_v17 = vadd.f32 %v1566_v15, %v4210_v55 }
 0x189   :  { %v1445_v18 = vpop.f32.mrf.mxu0  ;;  %v1568_v22 = vpop.f32.mrf.mxu1 }
 0x18a   :  { %v3214_v19 = vpack.c.bf16 %v1444_v23, %v1442_v14  ;;  %v3215_v47 = vpack.c.bf16 %v1567_v17, %v1565_v16  ;;  %v1446_v48 = vadd.f32 %v1445_v18, %v4193_v20  ;;  %v1569_v34 = vadd.f32 %v1568_v22, %v4205_v2 }
 0x18b   :  { %v1447_v24 = vpop.f32.mrf.mxu0  ;;  %v1570_v56 = vpop.f32.mrf.mxu1 }
 0x18c   :  { %2782 = vst [vmem:[#allocation2 + $0x120] sm:$0xff] %v3214_v19  ;;  %v1448_v25 = vadd.f32 %v1447_v24, %v4198_v21  ;;  %2783 = vst [vmem:[#allocation2 + $0x128] sm:$0xff] %v3215_v47  ;;  %v1571_v60 = vadd.f32 %v1570_v56, %v4210_v55 }
 0x18d   :  { %v1451_v61 = vpop.f32.mrf.mxu0  ;;  %v1574_v28 = vpop.f32.mrf.mxu1 }
 0x18e   :  { %v3222_v26 = vpack.c.bf16 %v1448_v25, %v1446_v48  ;;  %v3223_v58 = vpack.c.bf16 %v1571_v60, %v1569_v34  ;;  %v1452_v8 = vadd.f32 %v1451_v61, %v4193_v20  ;;  %v1575_v35 = vadd.f32 %v1574_v28, %v4205_v2 }
 0x18f   :  { %v1453_v30 = vpop.f32.mrf.mxu0  ;;  %v1576_v59 = vpop.f32.mrf.mxu1 }
 0x190   :  { %2790 = vst [vmem:[#allocation2 + $0x160] sm:$0xff] %v3222_v26  ;;  %v1454_v32 = vadd.f32 %v1453_v30, %v4198_v21  ;;  %2791 = vst [vmem:[#allocation2 + $0x168] sm:$0xff] %v3223_v58  ;;  %v1577_v27 = vadd.f32 %v1576_v59, %v4210_v55 }
 0x191   :  { %v1455_v36 = vpop.f32.mrf.mxu0  ;;  %v1578_v41 = vpop.f32.mrf.mxu1 }
 0x192   :  { %v3230_v40 = vpack.c.bf16 %v1454_v32, %v1452_v8  ;;  %v3231_v42 = vpack.c.bf16 %v1577_v27, %v1575_v35  ;;  %v1456_v44 = vadd.f32 %v1455_v36, %v4193_v20  ;;  %v1579_v49 = vadd.f32 %v1578_v41, %v4205_v2 }
 0x193   :  { %v1457_v43 = vpop.f32.mrf.mxu0  ;;  %v1580_v46 = vpop.f32.mrf.mxu1 }
 0x194   :  { %2798 = vst [vmem:[#allocation2 + $0x1a0] sm:$0xff] %v3230_v40  ;;  %v1458_v45 = vadd.f32 %v1457_v43, %v4198_v21  ;;  %2799 = vst [vmem:[#allocation2 + $0x1a8] sm:$0xff] %v3231_v42  ;;  %v1581_v50 = vadd.f32 %v1580_v46, %v4210_v55 }
 0x195   :  { %v1461_v51 = vpop.f32.mrf.mxu0  ;;  %v1584_v53 = vpop.f32.mrf.mxu1 }
 0x196   :  { %v3238_v52 = vpack.c.bf16 %v1458_v45, %v1456_v44  ;;  %v3239_v63 = vpack.c.bf16 %v1581_v50, %v1579_v49  ;;  %v1462_v37 = vadd.f32 %v1461_v51, %v4193_v20  ;;  %v1585_v1 = vadd.f32 %v1584_v53, %v4205_v2 }
 0x197   :  { %v1463_v0 = vpop.f32.mrf.mxu0  ;;  %v1586_v29 = vpop.f32.mrf.mxu1 }
 0x198   :  { %2806 = vst [vmem:[#allocation2 + $0x1e0] sm:$0xff] %v3238_v52  ;;  %v1464_v62 = vadd.f32 %v1463_v0, %v4198_v21  ;;  %2807 = vst [vmem:[#allocation2 + $0x1e8] sm:$0xff] %v3239_v63  ;;  %v1587_v57 = vadd.f32 %v1586_v29, %v4210_v55 }
 0x199   :  { %v1465_v3 = vpop.f32.mrf.mxu0  ;;  %v1588_v5 = vpop.f32.mrf.mxu1 }
 0x19a   :  { %v3246_v4 = vpack.c.bf16 %v1464_v62, %v1462_v37  ;;  %v3247_v31 = vpack.c.bf16 %v1587_v57, %v1585_v1  ;;  %v1466_v7 = vadd.f32 %v1465_v3, %v4193_v20  ;;  %v1589_v12 = vadd.f32 %v1588_v5, %v4205_v2 }
 0x19b   :  { %v1467_v6 = vpop.f32.mrf.mxu0  ;;  %v1590_v11 = vpop.f32.mrf.mxu1 }
 0x19c   :  { %2814 = vst [vmem:[#allocation2 + $0x220] sm:$0xff] %v3246_v4  ;;  %v1468_v9 = vadd.f32 %v1467_v6, %v4198_v21  ;;  %2815 = vst [vmem:[#allocation2 + $0x228] sm:$0xff] %v3247_v31  ;;  %v1591_v14 = vadd.f32 %v1590_v11, %v4210_v55 }
 0x19d   :  { %v1471_v23 = vpop.f32.mrf.mxu0  ;;  %v1594_v16 = vpop.f32.mrf.mxu1 }
 0x19e   :  { %v3254_v15 = vpack.c.bf16 %v1468_v9, %v1466_v7  ;;  %v3255_v17 = vpack.c.bf16 %v1591_v14, %v1589_v12  ;;  %v1472_v19 = vadd.f32 %v1471_v23, %v4193_v20  ;;  %v1595_v24 = vadd.f32 %v1594_v16, %v4205_v2 }
 0x19f   :  { %v1473_v18 = vpop.f32.mrf.mxu0  ;;  %v1596_v47 = vpop.f32.mrf.mxu1 }
 0x1a0   :  { %2822 = vst [vmem:[#allocation2 + $0x260] sm:$0xff] %v3254_v15  ;;  %v1474_v22 = vadd.f32 %v1473_v18, %v4198_v21  ;;  %2823 = vst [vmem:[#allocation2 + $0x268] sm:$0xff] %v3255_v17  ;;  %v1597_v48 = vadd.f32 %v1596_v47, %v4210_v55 }
 0x1a1   :  { %v1475_v25 = vpop.f32.mrf.mxu0  ;;  %v1598_v34 = vpop.f32.mrf.mxu1 }
 0x1a2   :  { %v3262_v56 = vpack.c.bf16 %v1474_v22, %v1472_v19  ;;  %v3263_v60 = vpack.c.bf16 %v1597_v48, %v1595_v24  ;;  %v1476_v26 = vadd.f32 %v1475_v25, %v4193_v20  ;;  %v1599_v30 = vadd.f32 %v1598_v34, %v4205_v2 }
 0x1a3   :  { %v1477_v61 = vpop.f32.mrf.mxu0  ;;  %v1600_v58 = vpop.f32.mrf.mxu1 }
 0x1a4   :  { %2830 = vst [vmem:[#allocation2 + $0x2a0] sm:$0xff] %v3262_v56  ;;  %v1478_v28 = vadd.f32 %v1477_v61, %v4198_v21  ;;  %2831 = vst [vmem:[#allocation2 + $0x2a8] sm:$0xff] %v3263_v60  ;;  %v1601_v8 = vadd.f32 %v1600_v58, %v4210_v55 }
 0x1a5   :  { %v1481_v32 = vpop.f32.mrf.mxu0  ;;  %v1604_v35 = vpop.f32.mrf.mxu1 }
 0x1a6   :  { %v3270_v59 = vpack.c.bf16 %v1478_v28, %v1476_v26  ;;  %v3271_v27 = vpack.c.bf16 %v1601_v8, %v1599_v30  ;;  %v1482_v40 = vadd.f32 %v1481_v32, %v4193_v20  ;;  %v1605_v43 = vadd.f32 %v1604_v35, %v4205_v2 }
 0x1a7   :  { %v1483_v36 = vpop.f32.mrf.mxu0  ;;  %v1606_v42 = vpop.f32.mrf.mxu1 }
 0x1a8   :  { %2838 = vst [vmem:[#allocation2 + $0x2e0] sm:$0xff] %v3270_v59  ;;  %v1484_v41 = vadd.f32 %v1483_v36, %v4198_v21  ;;  %2839 = vst [vmem:[#allocation2 + $0x2e8] sm:$0xff] %v3271_v27  ;;  %v1607_v44 = vadd.f32 %v1606_v42, %v4210_v55  ;;  %v4285_v36 = vrot.slane %v4186_v13, %v193_v10 }
 0x1a9   :  { %v1485_v45 = vpop.f32.mrf.mxu0  ;;  %v1608_v49 = vpop.f32.mrf.mxu1  ;;  %v4302_v10 = vrot.slane %v4186_v13, %v205_v39 }
 0x1aa   :  { %v3278_v46 = vpack.c.bf16 %v1484_v41, %v1482_v40  ;;  %v3279_v50 = vpack.c.bf16 %v1607_v44, %v1605_v43  ;;  %v1486_v52 = vadd.f32 %v1485_v45, %v4193_v20  ;;  %v1609_v0 = vadd.f32 %v1608_v49, %v4205_v2 }
 0x1ab   :  { %v1487_v51 = vpop.f32.mrf.mxu0  ;;  %v1610_v63 = vpop.f32.mrf.mxu1  ;;  %v4290_v40 = vrot.slane %v4186_v13, %v197_v33 }
 0x1ac   :  { %2846 = vst [vmem:[#allocation2 + $0x320] sm:$0xff] %v3278_v46  ;;  %v1488_v53 = vadd.f32 %v1487_v51, %v4198_v21  ;;  %2847 = vst [vmem:[#allocation2 + $0x328] sm:$0xff] %v3279_v50  ;;  %v1611_v37 = vadd.f32 %v1610_v63, %v4210_v55 }
 0x1ad   :  { %v1491_v62 = vpop.f32.mrf.mxu0  ;;  %v1614_v1 = vpop.f32.mrf.mxu1 }
 0x1ae   :  { %v3286_v29 = vpack.c.bf16 %v1488_v53, %v1486_v52  ;;  %v3287_v57 = vpack.c.bf16 %v1611_v37, %v1609_v0  ;;  %v1492_v4 = vadd.f32 %v1491_v62, %v4193_v20  ;;  %v1615_v6 = vadd.f32 %v1614_v1, %v4205_v2 }
 0x1af   :  { %v1493_v3 = vpop.f32.mrf.mxu0  ;;  %v1616_v31 = vpop.f32.mrf.mxu1 }
 0x1b0   :  { %2854 = vst [vmem:[#allocation2 + $0x360] sm:$0xff] %v3286_v29  ;;  %v1494_v5 = vadd.f32 %v1493_v3, %v4198_v21  ;;  %2855 = vst [vmem:[#allocation2 + $0x368] sm:$0xff] %v3287_v57  ;;  %v1617_v7 = vadd.f32 %v1616_v31, %v4210_v55 }
 0x1b1   :  { %v1495_v9 = vpop.f32.mrf.mxu0  ;;  %v1618_v12 = vpop.f32.mrf.mxu1 }
 0x1b2   :  { %v3294_v11 = vpack.c.bf16 %v1494_v5, %v1492_v4  ;;  %v3295_v14 = vpack.c.bf16 %v1617_v7, %v1615_v6  ;;  %v1496_v15 = vadd.f32 %v1495_v9, %v4193_v20  ;;  %v1619_v18 = vadd.f32 %v1618_v12, %v4205_v2 }
 0x1b3   :  { %v1497_v23 = vpop.f32.mrf.mxu0  ;;  %v1620_v17 = vpop.f32.mrf.mxu1 }
 0x1b4   :  { %2862 = vst [vmem:[#allocation2 + $0x3a0] sm:$0xff] %v3294_v11  ;;  %v1498_v16 = vadd.f32 %v1497_v23, %v4198_v21  ;;  %2863 = vst [vmem:[#allocation2 + $0x3a8] sm:$0xff] %v3295_v14  ;;  %v1621_v19 = vadd.f32 %v1620_v17, %v4210_v55 }
 0x1b5   :  { %v1501_v22 = vpop.f32.mrf.mxu0  ;;  %v1624_v24 = vpop.f32.mrf.mxu1 }
 0x1b6   :  { %v3302_v47 = vpack.c.bf16 %v1498_v16, %v1496_v15  ;;  %v3303_v48 = vpack.c.bf16 %v1621_v19, %v1619_v18  ;;  %v1502_v56 = vadd.f32 %v1501_v22, %v4193_v20  ;;  %v1625_v61 = vadd.f32 %v1624_v24, %v4205_v2 }
 0x1b7   :  { %v1503_v25 = vpop.f32.mrf.mxu0  ;;  %v1626_v60 = vpop.f32.mrf.mxu1 }
 0x1b8   :  { %2870 = vst [vmem:[#allocation2 + $0x3e0] sm:$0xff] %v3302_v47  ;;  %v1504_v34 = vadd.f32 %v1503_v25, %v4198_v21  ;;  %2871 = vst [vmem:[#allocation2 + $0x3e8] sm:$0xff] %v3303_v48  ;;  %v1627_v26 = vadd.f32 %v1626_v60, %v4210_v55 }
 0x1b9   :  { %v1505_v28 = vpop.f32.mrf.mxu0  ;;  %v1628_v30 = vpop.f32.mrf.mxu1 }
 0x1ba   :  { %v3310_v58 = vpack.c.bf16 %v1504_v34, %v1502_v56  ;;  %v3311_v8 = vpack.c.bf16 %v1627_v26, %v1625_v61  ;;  %v1506_v59 = vadd.f32 %v1505_v28, %v4193_v20  ;;  %v1629_v41 = vadd.f32 %v1628_v30, %v4205_v2 }
 0x1bb   :  { %v1507_v32 = vpop.f32.mrf.mxu0  ;;  %v1630_v27 = vpop.f32.mrf.mxu1  ;;  %v4297_v20 = vrot.slane %v4186_v13, %v201_v38 }
 0x1bc   :  { %2878 = vst [vmem:[#allocation2 + $0x420] sm:$0xff] %v3310_v58  ;;  %v1508_v35 = vadd.f32 %v1507_v32, %v4198_v21  ;;  %2879 = vst [vmem:[#allocation2 + $0x428] sm:$0xff] %v3311_v8  ;;  %v1631_v42 = vadd.f32 %v1630_v27, %v4210_v55 }
 0x1bd   :  { %v1667_v43 = vpop.f32.mrf.mxu0  ;;  %v1790_v44 = vpop.f32.mrf.mxu1 }
 0x1be   :  { %v3318_v21 = vpack.c.bf16 %v1508_v35, %v1506_v59  ;;  %v3319_v33 = vpack.c.bf16 %v1631_v42, %v1629_v41  ;;  %v1668_v2 = vadd.f32 %v1667_v43, %v4285_v36  ;;  %v1791_v38 = vadd.f32 %v1790_v44, %v4297_v20 }
 0x1bf   :  { %v1669_v45 = vpop.f32.mrf.mxu0  ;;  %v1792_v46 = vpop.f32.mrf.mxu1 }
 0x1c0   :  { %2886 = vst [vmem:[#allocation2 + $0x460] sm:$0xff] %v3318_v21  ;;  %v1670_v55 = vadd.f32 %v1669_v45, %v4290_v40  ;;  %2887 = vst [vmem:[#allocation2 + $0x468] sm:$0xff] %v3319_v33  ;;  %v1793_v54 = vadd.f32 %v1792_v46, %v4302_v10 }
 0x1c1   :  { %v1671_v49 = vpop.f32.mrf.mxu0  ;;  %v1794_v50 = vpop.f32.mrf.mxu1 }
 0x1c2   :  { %v3184_v39 = vpack.c.bf16 %v1670_v55, %v1668_v2  ;;  %v3185_v51 = vpack.c.bf16 %v1793_v54, %v1791_v38  ;;  %v1672_v53 = vadd.f32 %v1671_v49, %v4285_v36  ;;  %v1795_v37 = vadd.f32 %v1794_v50, %v4297_v20 }
 0x1c3   :  { %v1673_v52 = vpop.f32.mrf.mxu0  ;;  %v1796_v0 = vpop.f32.mrf.mxu1 }
 0x1c4   :  { %2749 = vst [vmem:[#allocation2 + $0x30] sm:$0xff] %v3184_v39  ;;  %v1674_v63 = vadd.f32 %v1673_v52, %v4290_v40  ;;  %2753 = vst.msk [vmem:[#allocation2 + $0x38] sm:$0xff] %vm4308_vm2, %v3185_v51  ;;  %v1797_v62 = vadd.f32 %v1796_v0, %v4302_v10 }
 0x1c5   :  { %v1677_v29 = vpop.f32.mrf.mxu0  ;;  %v1800_v57 = vpop.f32.mrf.mxu1 }
 0x1c6   :  { %v3192_v1 = vpack.c.bf16 %v1674_v63, %v1672_v53  ;;  %v3193_v3 = vpack.c.bf16 %v1797_v62, %v1795_v37  ;;  %v1678_v5 = vadd.f32 %v1677_v29, %v4285_v36  ;;  %v1801_v7 = vadd.f32 %v1800_v57, %v4297_v20 }
 0x1c7   :  { %v1679_v4 = vpop.f32.mrf.mxu0  ;;  %v1802_v6 = vpop.f32.mrf.mxu1 }
 0x1c8   :  { %2760 = vst [vmem:[#allocation2 + $0x70] sm:$0xff] %v3192_v1  ;;  %v1680_v31 = vadd.f32 %v1679_v4, %v4290_v40  ;;  %2761 = vst.msk [vmem:[#allocation2 + $0x78] sm:$0xff] %vm4308_vm2, %v3193_v3  ;;  %v1803_v9 = vadd.f32 %v1802_v6, %v4302_v10 }
 0x1c9   :  { %v1681_v11 = vpop.f32.mrf.mxu0  ;;  %v1804_v14 = vpop.f32.mrf.mxu1 }
 0x1ca   :  { %v3200_v12 = vpack.c.bf16 %v1680_v31, %v1678_v5  ;;  %v3201_v23 = vpack.c.bf16 %v1803_v9, %v1801_v7  ;;  %v1682_v16 = vadd.f32 %v1681_v11, %v4285_v36  ;;  %v1805_v19 = vadd.f32 %v1804_v14, %v4297_v20 }
 0x1cb   :  { %v1683_v15 = vpop.f32.mrf.mxu0  ;;  %v1806_v18 = vpop.f32.mrf.mxu1 }
 0x1cc   :  { %2768 = vst [vmem:[#allocation2 + $0xb0] sm:$0xff] %v3200_v12  ;;  %v1684_v17 = vadd.f32 %v1683_v15, %v4290_v40  ;;  %2769 = vst.msk [vmem:[#allocation2 + $0xb8] sm:$0xff] %vm4308_vm2, %v3201_v23  ;;  %v1807_v22 = vadd.f32 %v1806_v18, %v4302_v10 }
 0x1cd   :  { %v1687_v47 = vpop.f32.mrf.mxu0  ;;  %v1810_v48 = vpop.f32.mrf.mxu1 }
 0x1ce   :  { %v3208_v24 = vpack.c.bf16 %v1684_v17, %v1682_v16  ;;  %v3209_v25 = vpack.c.bf16 %v1807_v22, %v1805_v19  ;;  %v1688_v34 = vadd.f32 %v1687_v47, %v4285_v36  ;;  %v1811_v26 = vadd.f32 %v1810_v48, %v4297_v20 }
 0x1cf   :  { %v1689_v56 = vpop.f32.mrf.mxu0  ;;  %v1812_v61 = vpop.f32.mrf.mxu1 }
 0x1d0   :  { %2776 = vst [vmem:[#allocation2 + $0xf0] sm:$0xff] %v3208_v24  ;;  %v1690_v60 = vadd.f32 %v1689_v56, %v4290_v40  ;;  %2777 = vst.msk [vmem:[#allocation2 + $0xf8] sm:$0xff] %vm4308_vm2, %v3209_v25  ;;  %v1813_v28 = vadd.f32 %v1812_v61, %v4302_v10 }
 0x1d1   :  { %v1691_v58 = vpop.f32.mrf.mxu0  ;;  %v1814_v8 = vpop.f32.mrf.mxu1 }
 0x1d2   :  { %v3216_v30 = vpack.c.bf16 %v1690_v60, %v1688_v34  ;;  %v3217_v32 = vpack.c.bf16 %v1813_v28, %v1811_v26  ;;  %v1692_v35 = vadd.f32 %v1691_v58, %v4285_v36  ;;  %v1815_v42 = vadd.f32 %v1814_v8, %v4297_v20 }
 0x1d3   :  { %v1693_v59 = vpop.f32.mrf.mxu0  ;;  %v1816_v41 = vpop.f32.mrf.mxu1 }
 0x1d4   :  { %2784 = vst [vmem:[#allocation2 + $0x130] sm:$0xff] %v3216_v30  ;;  %v1694_v27 = vadd.f32 %v1693_v59, %v4290_v40  ;;  %2785 = vst.msk [vmem:[#allocation2 + $0x138] sm:$0xff] %vm4308_vm2, %v3217_v32  ;;  %v1817_v43 = vadd.f32 %v1816_v41, %v4302_v10 }
 0x1d5   :  { %v1697_v21 = vpop.f32.mrf.mxu0  ;;  %v1820_v33 = vpop.f32.mrf.mxu1 }
 0x1d6   :  { %v3224_v44 = vpack.c.bf16 %v1694_v27, %v1692_v35  ;;  %v3225_v45 = vpack.c.bf16 %v1817_v43, %v1815_v42  ;;  %v1698_v55 = vadd.f32 %v1697_v21, %v4285_v36  ;;  %v1821_v54 = vadd.f32 %v1820_v33, %v4297_v20 }
 0x1d7   :  { %v1699_v2 = vpop.f32.mrf.mxu0  ;;  %v1822_v38 = vpop.f32.mrf.mxu1 }
 0x1d8   :  { %2792 = vst [vmem:[#allocation2 + $0x170] sm:$0xff] %v3224_v44  ;;  %v1700_v46 = vadd.f32 %v1699_v2, %v4290_v40  ;;  %2793 = vst.msk [vmem:[#allocation2 + $0x178] sm:$0xff] %vm4308_vm2, %v3225_v45  ;;  %v1823_v49 = vadd.f32 %v1822_v38, %v4302_v10 }
 0x1d9   :  { %v1701_v39 = vpop.f32.mrf.mxu0  ;;  %v1824_v51 = vpop.f32.mrf.mxu1 }
 0x1da   :  { %v3232_v50 = vpack.c.bf16 %v1700_v46, %v1698_v55  ;;  %v3233_v52 = vpack.c.bf16 %v1823_v49, %v1821_v54  ;;  %v1702_v63 = vadd.f32 %v1701_v39, %v4285_v36  ;;  %v1825_v62 = vadd.f32 %v1824_v51, %v4297_v20 }
 0x1db   :  { %v1703_v53 = vpop.f32.mrf.mxu0  ;;  %v1826_v37 = vpop.f32.mrf.mxu1 }
 0x1dc   :  { %2800 = vst [vmem:[#allocation2 + $0x1b0] sm:$0xff] %v3232_v50  ;;  %v1704_v0 = vadd.f32 %v1703_v53, %v4290_v40  ;;  %2801 = vst.msk [vmem:[#allocation2 + $0x1b8] sm:$0xff] %vm4308_vm2, %v3233_v52  ;;  %v1827_v29 = vadd.f32 %v1826_v37, %v4302_v10 }
 0x1dd   :  { %v1707_v1 = vpop.f32.mrf.mxu0  ;;  %v1830_v3 = vpop.f32.mrf.mxu1 }
 0x1de   :  { %v3240_v57 = vpack.c.bf16 %v1704_v0, %v1702_v63  ;;  %v3241_v4 = vpack.c.bf16 %v1827_v29, %v1825_v62  ;;  %v1708_v31 = vadd.f32 %v1707_v1, %v4285_v36  ;;  %v1831_v9 = vadd.f32 %v1830_v3, %v4297_v20 }
 0x1df   :  { %v1709_v5 = vpop.f32.mrf.mxu0  ;;  %v1832_v7 = vpop.f32.mrf.mxu1 }
 0x1e0   :  { %2808 = vst [vmem:[#allocation2 + $0x1f0] sm:$0xff] %v3240_v57  ;;  %v1710_v6 = vadd.f32 %v1709_v5, %v4290_v40  ;;  %2809 = vst.msk [vmem:[#allocation2 + $0x1f8] sm:$0xff] %vm4308_vm2, %v3241_v4  ;;  %v1833_v11 = vadd.f32 %v1832_v7, %v4302_v10 }
 0x1e1   :  { %v1711_v12 = vpop.f32.mrf.mxu0  ;;  %v1834_v23 = vpop.f32.mrf.mxu1 }
 0x1e2   :  { %v3248_v14 = vpack.c.bf16 %v1710_v6, %v1708_v31  ;;  %v3249_v15 = vpack.c.bf16 %v1833_v11, %v1831_v9  ;;  %v1712_v17 = vadd.f32 %v1711_v12, %v4285_v36  ;;  %v1835_v22 = vadd.f32 %v1834_v23, %v4297_v20 }
 0x1e3   :  { %v1713_v16 = vpop.f32.mrf.mxu0  ;;  %v1836_v19 = vpop.f32.mrf.mxu1 }
 0x1e4   :  { %2816 = vst [vmem:[#allocation2 + $0x230] sm:$0xff] %v3248_v14  ;;  %v1714_v18 = vadd.f32 %v1713_v16, %v4290_v40  ;;  %2817 = vst.msk [vmem:[#allocation2 + $0x238] sm:$0xff] %vm4308_vm2, %v3249_v15  ;;  %v1837_v47 = vadd.f32 %v1836_v19, %v4302_v10 }
 0x1e5   :  { %v1717_v24 = vpop.f32.mrf.mxu0  ;;  %v1840_v25 = vpop.f32.mrf.mxu1 }
 0x1e6   :  { %v3256_v48 = vpack.c.bf16 %v1714_v18, %v1712_v17  ;;  %v3257_v56 = vpack.c.bf16 %v1837_v47, %v1835_v22  ;;  %v1718_v60 = vadd.f32 %v1717_v24, %v4285_v36  ;;  %v1841_v28 = vadd.f32 %v1840_v25, %v4297_v20 }
 0x1e7   :  { %v1719_v34 = vpop.f32.mrf.mxu0  ;;  %v1842_v26 = vpop.f32.mrf.mxu1 }
 0x1e8   :  { %2824 = vst [vmem:[#allocation2 + $0x270] sm:$0xff] %v3256_v48  ;;  %v1720_v61 = vadd.f32 %v1719_v34, %v4290_v40  ;;  %2825 = vst.msk [vmem:[#allocation2 + $0x278] sm:$0xff] %vm4308_vm2, %v3257_v56  ;;  %v1843_v58 = vadd.f32 %v1842_v26, %v4302_v10 }
 0x1e9   :  { %v1721_v30 = vpop.f32.mrf.mxu0  ;;  %v1844_v32 = vpop.f32.mrf.mxu1 }
 0x1ea   :  { %v3264_v8 = vpack.c.bf16 %v1720_v61, %v1718_v60  ;;  %v3265_v59 = vpack.c.bf16 %v1843_v58, %v1841_v28  ;;  %v1722_v27 = vadd.f32 %v1721_v30, %v4285_v36  ;;  %v1845_v43 = vadd.f32 %v1844_v32, %v4297_v20 }
 0x1eb   :  { %v1723_v35 = vpop.f32.mrf.mxu0  ;;  %v1846_v42 = vpop.f32.mrf.mxu1 }
 0x1ec   :  { %2832 = vst [vmem:[#allocation2 + $0x2b0] sm:$0xff] %v3264_v8  ;;  %v1724_v41 = vadd.f32 %v1723_v35, %v4290_v40  ;;  %2833 = vst.msk [vmem:[#allocation2 + $0x2b8] sm:$0xff] %vm4308_vm2, %v3265_v59  ;;  %v1847_v21 = vadd.f32 %v1846_v42, %v4302_v10 }
 0x1ed   :  { %v1727_v44 = vpop.f32.mrf.mxu0  ;;  %v1850_v45 = vpop.f32.mrf.mxu1 }
 0x1ee   :  { %v3272_v33 = vpack.c.bf16 %v1724_v41, %v1722_v27  ;;  %v3273_v2 = vpack.c.bf16 %v1847_v21, %v1845_v43  ;;  %v1728_v46 = vadd.f32 %v1727_v44, %v4285_v36  ;;  %v1851_v49 = vadd.f32 %v1850_v45, %v4297_v20 }
 0x1ef   :  { %v1729_v55 = vpop.f32.mrf.mxu0  ;;  %v1852_v54 = vpop.f32.mrf.mxu1 }
 0x1f0   :  { %2840 = vst [vmem:[#allocation2 + $0x2f0] sm:$0xff] %v3272_v33  ;;  %v1730_v38 = vadd.f32 %v1729_v55, %v4290_v40  ;;  %2841 = vst.msk [vmem:[#allocation2 + $0x2f8] sm:$0xff] %vm4308_vm2, %v3273_v2  ;;  %v1853_v39 = vadd.f32 %v1852_v54, %v4302_v10 }
 0x1f1   :  { %v1731_v50 = vpop.f32.mrf.mxu0  ;;  %v1854_v52 = vpop.f32.mrf.mxu1 }
 0x1f2   :  { %v3280_v51 = vpack.c.bf16 %v1730_v38, %v1728_v46  ;;  %v3281_v53 = vpack.c.bf16 %v1853_v39, %v1851_v49  ;;  %v1732_v0 = vadd.f32 %v1731_v50, %v4285_v36  ;;  %v1855_v29 = vadd.f32 %v1854_v52, %v4297_v20 }
 0x1f3   :  { %v1733_v63 = vpop.f32.mrf.mxu0  ;;  %v1856_v62 = vpop.f32.mrf.mxu1 }
 0x1f4   :  { %2848 = vst [vmem:[#allocation2 + $0x330] sm:$0xff] %v3280_v51  ;;  %v1734_v37 = vadd.f32 %v1733_v63, %v4290_v40  ;;  %2849 = vst.msk [vmem:[#allocation2 + $0x338] sm:$0xff] %vm4308_vm2, %v3281_v53  ;;  %v1857_v1 = vadd.f32 %v1856_v62, %v4302_v10 }
 0x1f5   :  { %v1737_v57 = vpop.f32.mrf.mxu0  ;;  %v1860_v4 = vpop.f32.mrf.mxu1 }
 0x1f6   :  { %v3288_v3 = vpack.c.bf16 %v1734_v37, %v1732_v0  ;;  %v3289_v5 = vpack.c.bf16 %v1857_v1, %v1855_v29  ;;  %v1738_v6 = vadd.f32 %v1737_v57, %v4285_v36  ;;  %v1861_v11 = vadd.f32 %v1860_v4, %v4297_v20 }
 0x1f7   :  { %v1739_v31 = vpop.f32.mrf.mxu0  ;;  %v1862_v9 = vpop.f32.mrf.mxu1 }
 0x1f8   :  { %2856 = vst [vmem:[#allocation2 + $0x370] sm:$0xff] %v3288_v3  ;;  %v1740_v7 = vadd.f32 %v1739_v31, %v4290_v40  ;;  %2857 = vst.msk [vmem:[#allocation2 + $0x378] sm:$0xff] %vm4308_vm2, %v3289_v5  ;;  %v1863_v12 = vadd.f32 %v1862_v9, %v4302_v10 }
 0x1f9   :  { %v1741_v14 = vpop.f32.mrf.mxu0  ;;  %v1864_v15 = vpop.f32.mrf.mxu1 }
 0x1fa   :  { %v3296_v23 = vpack.c.bf16 %v1740_v7, %v1738_v6  ;;  %v3297_v16 = vpack.c.bf16 %v1863_v12, %v1861_v11  ;;  %v1742_v18 = vadd.f32 %v1741_v14, %v4285_v36  ;;  %v1865_v47 = vadd.f32 %v1864_v15, %v4297_v20 }
 0x1fb   :  { %v1743_v17 = vpop.f32.mrf.mxu0  ;;  %v1866_v22 = vpop.f32.mrf.mxu1 }
 0x1fc   :  { %2864 = vst [vmem:[#allocation2 + $0x3b0] sm:$0xff] %v3296_v23  ;;  %v1744_v19 = vadd.f32 %v1743_v17, %v4290_v40  ;;  %2865 = vst.msk [vmem:[#allocation2 + $0x3b8] sm:$0xff] %vm4308_vm2, %v3297_v16  ;;  %v1867_v24 = vadd.f32 %v1866_v22, %v4302_v10 }
 0x1fd   :  { %v1747_v48 = vpop.f32.mrf.mxu0  ;;  %v1870_v56 = vpop.f32.mrf.mxu1 }
 0x1fe   :  { %v3304_v25 = vpack.c.bf16 %v1744_v19, %v1742_v18  ;;  %v3305_v34 = vpack.c.bf16 %v1867_v24, %v1865_v47  ;;  %v1748_v61 = vadd.f32 %v1747_v48, %v4285_v36  ;;  %v1871_v58 = vadd.f32 %v1870_v56, %v4297_v20 }
 0x1ff   :  { %v1749_v60 = vpop.f32.mrf.mxu0  ;;  %v1872_v28 = vpop.f32.mrf.mxu1 }
 0x200   :  { %2872 = vst [vmem:[#allocation2 + $0x3f0] sm:$0xff] %v3304_v25  ;;  %v1750_v26 = vadd.f32 %v1749_v60, %v4290_v40  ;;  %2873 = vst.msk [vmem:[#allocation2 + $0x3f8] sm:$0xff] %vm4308_vm2, %v3305_v34  ;;  %v1873_v30 = vadd.f32 %v1872_v28, %v4302_v10 }
 0x201   :  { %v1751_v8 = vpop.f32.mrf.mxu0  ;;  %v1874_v59 = vpop.f32.mrf.mxu1 }
 0x202   :  { %v3312_v32 = vpack.c.bf16 %v1750_v26, %v1748_v61  ;;  %v3313_v35 = vpack.c.bf16 %v1873_v30, %v1871_v58  ;;  %v1752_v41 = vadd.f32 %v1751_v8, %v4285_v36  ;;  %v1875_v21 = vadd.f32 %v1874_v59, %v4297_v20 }
 0x203   :  { %v1753_v27 = vpop.f32.mrf.mxu0  ;;  %v1876_v43 = vpop.f32.mrf.mxu1 }
 0x204   :  { %2880 = vst [vmem:[#allocation2 + $0x430] sm:$0xff] %v3312_v32  ;;  %v1754_v42 = vadd.f32 %v1753_v27, %v4290_v40  ;;  %2881 = vst.msk [vmem:[#allocation2 + $0x438] sm:$0xff] %vm4308_vm2, %v3313_v35  ;;  %v1877_v44 = vadd.f32 %v1876_v43, %v4302_v10 }
 0x206   :  { %v3320_v33 = vpack.c.bf16 %v1754_v42, %v1752_v41  ;;  %v3321_v45 = vpack.c.bf16 %v1877_v44, %v1875_v21 }
 0x208   :  { %2888 = vst [vmem:[#allocation2 + $0x470] sm:$0xff] %v3320_v33  ;;  %2889 = vst.msk [vmem:[#allocation2 + $0x478] sm:$0xff] %vm4308_vm2, %v3321_v45 }
 0x209   :  { %3337 = shalt.err (!%p3334_p4)
}
 0x20a   :  { %s3350_s7 = smov 1024   ;;  %s3351_s8 = smov 64  }
 0x20b   :  { %2901 = dma.vmem_to_hbm [thread:$0]  %s2896_s5, 18432, %s4422_s3, [#allocation3], %s3350_s7, %s3350_s7, %s3351_s8  }
 0x20c   :  { %3346 = dma.done.wait [#allocation3], 18432  }
 0x20d   :  { %3347 = vsyncadd [#allocation3], 4294948864 }
 0x20e   :  { %2905 = vsyncpa [#allocation3], 1 }

</bundles_post_ra>
